<compile_context>
chip_gen: v7x
topology: tpu7x:2x2x1
jax: 0.10.0
libtpu: 0.0.40
codegen_flags: <defaults>
</compile_context>

<pallas_src>
import functools

import jax
import jax.numpy as jnp
from jax.experimental import pallas as pl
from jax.experimental.pallas import tpu as pltpu

D_IN = 768        # DeiT-base hidden size ([CLS] embedding)
D1, D2, D3 = 512, 256, 128
PAD_OUT = 128     # lane-dense padded logits width


# ---------------------------------------------------------------------------
# Per-head MLP kernel.  Grid iterates over heads; each step sees one head's
# bf16 weight blocks and the shared [B, 768] feature block.
# ---------------------------------------------------------------------------
def mlp_heads_kernel(x_ref, w1, b1, w2, b2, w3, b3, w4, b4, out_ref):
    # x_ref: [B, 768] f32 CLS features (same block for every head)
    # w*:    [1, din, dout] bf16 per-head weights;  b*: [1, 1, dout] f32 biases
    z = x_ref[...]
    z = jnp.maximum(
        jnp.dot(z.astype(jnp.bfloat16), w1[0],
                preferred_element_type=jnp.float32) + b1[0], 0.0)
    z = jnp.maximum(
        jnp.dot(z.astype(jnp.bfloat16), w2[0],
                preferred_element_type=jnp.float32) + b2[0], 0.0)
    z = jnp.maximum(
        jnp.dot(z.astype(jnp.bfloat16), w3[0],
                preferred_element_type=jnp.float32) + b3[0], 0.0)
    # Dropout(p=0.3) layers are identity in eval mode.
    out_ref[0] = jnp.dot(z.astype(jnp.bfloat16), w4[0],
                         preferred_element_type=jnp.float32) + b4[0]


# ---------------------------------------------------------------------------
# Wrapper: padding of the last layer to 128 lanes + BlockSpec plumbing.
# ---------------------------------------------------------------------------
@functools.partial(jax.jit, static_argnames=("num_heads", "num_class"))
def multi_head_forward(x2, params, *, num_heads, num_class):
    B, d = x2.shape
    assert d == D_IN

    # Pad the final layer to 128 output lanes -> dense (unmasked) output stores.
    w4p = jnp.zeros((num_heads, D3, PAD_OUT), jnp.bfloat16)
    w4p = w4p.at[:, :, :num_class].set(params["w4"])
    b4p = jnp.zeros((num_heads, 1, PAD_OUT), jnp.float32)
    b4p = b4p.at[:, :, :num_class].set(params["b4"])

    head_spec = lambda h: (h, 0, 0)

    logits_p = pl.pallas_call(
        mlp_heads_kernel,
        out_shape=jax.ShapeDtypeStruct((num_heads, B, PAD_OUT), jnp.float32),
        grid=(num_heads,),
        in_specs=[
            pl.BlockSpec((B, D_IN), lambda h: (0, 0)),       # shared features
            pl.BlockSpec((1, D_IN, D1), head_spec),
            pl.BlockSpec((1, 1, D1), head_spec),
            pl.BlockSpec((1, D1, D2), head_spec),
            pl.BlockSpec((1, 1, D2), head_spec),
            pl.BlockSpec((1, D2, D3), head_spec),
            pl.BlockSpec((1, 1, D3), head_spec),
            pl.BlockSpec((1, D3, PAD_OUT), head_spec),
            pl.BlockSpec((1, 1, PAD_OUT), head_spec),
        ],
        out_specs=pl.BlockSpec((1, B, PAD_OUT), head_spec),
        compiler_params=pltpu.CompilerParams(
            dimension_semantics=("parallel",)),
    )(x2, params["w1"], params["b1"], params["w2"], params["b2"],
      params["w3"], params["b3"], w4p, b4p)

    logits = logits_p[:, :, :num_class]          # [heads, B, num_class]
    h = jnp.transpose(logits, (1, 0, 2))         # [B, heads, num_class]
    head_list = [h[:, i, :] for i in range(num_heads)]
    return h, head_list


# ---------------------------------------------------------------------------
# Deterministic synthetic parameters (shapes follow the module __init__).
# Linear weights are stored [in, out] (transposed vs torch) in bf16;
# biases stay f32.
# ---------------------------------------------------------------------------
def init_params(key, num_heads, num_class):
    ks = jax.random.split(key, 8)
    dims = [(D_IN, D1), (D1, D2), (D2, D3), (D3, num_class)]

    def wgt(k, shape, fan_in):
        w = jax.random.normal(k, shape, jnp.float32) * jnp.sqrt(2.0 / fan_in)
        return w.astype(jnp.bfloat16)

    p = {}
    for i, (din, dout) in enumerate(dims):
        p[f"w{i + 1}"] = wgt(ks[2 * i], (num_heads, din, dout), din)
        p[f"b{i + 1}"] = 0.01 * jax.random.normal(
            ks[2 * i + 1], (num_heads, 1, dout), jnp.float32)
    return p


# ---------------------------------------------------------------------------
# Pure-JAX reference (f32 math on the same bf16-stored weights).
# ---------------------------------------------------------------------------
def reference_forward(x2, p, num_heads, num_class):
    B = x2.shape[0]
    outs = []
    for hd in range(num_heads):
        z = jnp.maximum(x2 @ p["w1"][hd].astype(jnp.float32) + p["b1"][hd], 0.0)
        z = jnp.maximum(z @ p["w2"][hd].astype(jnp.float32) + p["b2"][hd], 0.0)
        z = jnp.maximum(z @ p["w3"][hd].astype(jnp.float32) + p["b3"][hd], 0.0)
        outs.append(z @ p["w4"][hd].astype(jnp.float32) + p["b4"][hd])
    head_outputs = jnp.concatenate(outs, axis=1)          # [B, heads*num_class]
    h = head_outputs.reshape(B, num_heads, num_class)
    return h, outs


if __name__ == "__main__":
    num_heads, num_class = 3, 5
    B = 2

    key = jax.random.PRNGKey(0)
    kx, kp = jax.random.split(key)
    # TODO(synk): synthetic stand-in for the frozen DeiT backbone's [CLS] output.
    x2 = jax.random.normal(kx, (B, D_IN), jnp.float32)
    params = init_params(kp, num_heads, num_class)

    h, head_list = multi_head_forward(
        x2, params, num_heads=num_heads, num_class=num_class)
    jax.block_until_ready((h, head_list))

    assert h.shape == (B, num_heads, num_class)
    assert len(head_list) == num_heads
    assert all(o.shape == (B, num_class) for o in head_list)

    h_ref, outs_ref = reference_forward(x2, params, num_heads, num_class)
    assert jnp.allclose(h, h_ref, atol=5e-2, rtol=5e-2), \
        float(jnp.max(jnp.abs(h - h_ref)))
    for o, o_ref in zip(head_list, outs_ref):
        assert jnp.allclose(o, o_ref, atol=5e-2, rtol=5e-2)

    print("KERNEL_OK")
</pallas_src>

<mosaic_0001>
module attributes {stable_mosaic.version = 11 : i64} {
  func.func @mlp_heads_kernel(%arg0: i32, %arg1: memref<2x768xf32, #tpu.memory_space<vmem>>, %arg2: memref<1x768x512xbf16, #tpu.memory_space<vmem>>, %arg3: memref<1x1x512xf32, #tpu.memory_space<vmem>>, %arg4: memref<1x512x256xbf16, #tpu.memory_space<vmem>>, %arg5: memref<1x1x256xf32, #tpu.memory_space<vmem>>, %arg6: memref<1x256x128xbf16, #tpu.memory_space<vmem>>, %arg7: memref<1x1x128xf32, #tpu.memory_space<vmem>>, %arg8: memref<1x128x128xbf16, #tpu.memory_space<vmem>>, %arg9: memref<1x1x128xf32, #tpu.memory_space<vmem>>, %arg10: memref<1x2x128xf32, #tpu.memory_space<vmem>>) attributes {dimension_semantics = [#tpu.dimension_semantics<parallel>], iteration_bounds = array<i64: 3>, scalar_prefetch = 0 : i64, scratch_operands = 0 : i64, tpu.core_type = #tpu.core_type<tc>, window_params = [{pipeline_mode = #tpu.pipeline_mode<synchronous>, transform_indices = @transform_0, window_bounds = array<i64: 2, 768>}, {transform_indices = @transform_1, window_bounds = array<i64: 1, 768, 512>}, {transform_indices = @transform_2, window_bounds = array<i64: 1, 1, 512>}, {transform_indices = @transform_3, window_bounds = array<i64: 1, 512, 256>}, {transform_indices = @transform_4, window_bounds = array<i64: 1, 1, 256>}, {transform_indices = @transform_5, window_bounds = array<i64: 1, 256, 128>}, {transform_indices = @transform_6, window_bounds = array<i64: 1, 1, 128>}, {transform_indices = @transform_7, window_bounds = array<i64: 1, 128, 128>}, {transform_indices = @transform_8, window_bounds = array<i64: 1, 1, 128>}, {transform_indices = @transform_9, window_bounds = array<i64: 1, 2, 128>}]} {
    %c0 = arith.constant 0 : index
    %c0_0 = arith.constant 0 : index
    %0 = vector.load %arg1[%c0, %c0_0] : memref<2x768xf32, #tpu.memory_space<vmem>>, vector<2x768xf32>
    %1 = arith.truncf %0 : vector<2x768xf32> to vector<2x768xbf16>
    %c0_1 = arith.constant 0 : index
    %c0_2 = arith.constant 0 : index
    %c0_3 = arith.constant 0 : index
    %2 = vector.load %arg2[%c0_1, %c0_2, %c0_3] : memref<1x768x512xbf16, #tpu.memory_space<vmem>>, vector<1x768x512xbf16>
    %3 = vector.shape_cast %2 : vector<1x768x512xbf16> to vector<768x512xbf16>
    %cst = arith.constant dense<0.000000e+00> : vector<2x512xf32>
    %4 = tpu.matmul %1, %3, %cst {dimension_numbers = #tpu.dot_dimension_numbers<[1], [0], [0], [1], [0, 0, 1, 1], [], []>} : vector<2x768xbf16>, vector<768x512xbf16>, vector<2x512xf32> -> vector<2x512xf32>
    %c0_4 = arith.constant 0 : index
    %c0_5 = arith.constant 0 : index
    %c0_6 = arith.constant 0 : index
    %5 = vector.load %arg3[%c0_4, %c0_5, %c0_6] : memref<1x1x512xf32, #tpu.memory_space<vmem>>, vector<1x1x512xf32>
    %6 = vector.shape_cast %5 : vector<1x1x512xf32> to vector<1x512xf32>
    %7 = vector.broadcast %6 : vector<1x512xf32> to vector<2x512xf32>
    %8 = arith.addf %4, %7 : vector<2x512xf32>
    %cst_7 = arith.constant 0.000000e+00 : f32
    %9 = vector.broadcast %cst_7 : f32 to vector<2x512xf32>
    %10 = arith.maximumf %8, %9 : vector<2x512xf32>
    %11 = arith.truncf %10 : vector<2x512xf32> to vector<2x512xbf16>
    %c0_8 = arith.constant 0 : index
    %c0_9 = arith.constant 0 : index
    %c0_10 = arith.constant 0 : index
    %12 = vector.load %arg4[%c0_8, %c0_9, %c0_10] : memref<1x512x256xbf16, #tpu.memory_space<vmem>>, vector<1x512x256xbf16>
    %13 = vector.shape_cast %12 : vector<1x512x256xbf16> to vector<512x256xbf16>
    %cst_11 = arith.constant dense<0.000000e+00> : vector<2x256xf32>
    %14 = tpu.matmul %11, %13, %cst_11 {dimension_numbers = #tpu.dot_dimension_numbers<[1], [0], [0], [1], [0, 0, 1, 1], [], []>} : vector<2x512xbf16>, vector<512x256xbf16>, vector<2x256xf32> -> vector<2x256xf32>
    %c0_12 = arith.constant 0 : index
    %c0_13 = arith.constant 0 : index
    %c0_14 = arith.constant 0 : index
    %15 = vector.load %arg5[%c0_12, %c0_13, %c0_14] : memref<1x1x256xf32, #tpu.memory_space<vmem>>, vector<1x1x256xf32>
    %16 = vector.shape_cast %15 : vector<1x1x256xf32> to vector<1x256xf32>
    %17 = vector.broadcast %16 : vector<1x256xf32> to vector<2x256xf32>
    %18 = arith.addf %14, %17 : vector<2x256xf32>
    %cst_15 = arith.constant 0.000000e+00 : f32
    %19 = vector.broadcast %cst_15 : f32 to vector<2x256xf32>
    %20 = arith.maximumf %18, %19 : vector<2x256xf32>
    %21 = arith.truncf %20 : vector<2x256xf32> to vector<2x256xbf16>
    %c0_16 = arith.constant 0 : index
    %c0_17 = arith.constant 0 : index
    %c0_18 = arith.constant 0 : index
    %22 = vector.load %arg6[%c0_16, %c0_17, %c0_18] : memref<1x256x128xbf16, #tpu.memory_space<vmem>>, vector<1x256x128xbf16>
    %23 = vector.shape_cast %22 : vector<1x256x128xbf16> to vector<256x128xbf16>
    %cst_19 = arith.constant dense<0.000000e+00> : vector<2x128xf32>
    %24 = tpu.matmul %21, %23, %cst_19 {dimension_numbers = #tpu.dot_dimension_numbers<[1], [0], [0], [1], [0, 0, 1, 1], [], []>} : vector<2x256xbf16>, vector<256x128xbf16>, vector<2x128xf32> -> vector<2x128xf32>
    %c0_20 = arith.constant 0 : index
    %c0_21 = arith.constant 0 : index
    %c0_22 = arith.constant 0 : index
    %25 = vector.load %arg7[%c0_20, %c0_21, %c0_22] : memref<1x1x128xf32, #tpu.memory_space<vmem>>, vector<1x1x128xf32>
    %26 = vector.shape_cast %25 : vector<1x1x128xf32> to vector<1x128xf32>
    %27 = vector.broadcast %26 : vector<1x128xf32> to vector<2x128xf32>
    %28 = arith.addf %24, %27 : vector<2x128xf32>
    %cst_23 = arith.constant 0.000000e+00 : f32
    %29 = vector.broadcast %cst_23 : f32 to vector<2x128xf32>
    %30 = arith.maximumf %28, %29 : vector<2x128xf32>
    %31 = arith.truncf %30 : vector<2x128xf32> to vector<2x128xbf16>
    %c0_24 = arith.constant 0 : index
    %c0_25 = arith.constant 0 : index
    %c0_26 = arith.constant 0 : index
    %32 = vector.load %arg8[%c0_24, %c0_25, %c0_26] : memref<1x128x128xbf16, #tpu.memory_space<vmem>>, vector<1x128x128xbf16>
    %33 = vector.shape_cast %32 : vector<1x128x128xbf16> to vector<128x128xbf16>
    %cst_27 = arith.constant dense<0.000000e+00> : vector<2x128xf32>
    %34 = tpu.matmul %31, %33, %cst_27 {dimension_numbers = #tpu.dot_dimension_numbers<[1], [0], [0], [1], [0, 0, 1, 1], [], []>} : vector<2x128xbf16>, vector<128x128xbf16>, vector<2x128xf32> -> vector<2x128xf32>
    %c0_28 = arith.constant 0 : index
    %c0_29 = arith.constant 0 : index
    %c0_30 = arith.constant 0 : index
    %35 = vector.load %arg9[%c0_28, %c0_29, %c0_30] : memref<1x1x128xf32, #tpu.memory_space<vmem>>, vector<1x1x128xf32>
    %36 = vector.shape_cast %35 : vector<1x1x128xf32> to vector<1x128xf32>
    %37 = vector.broadcast %36 : vector<1x128xf32> to vector<2x128xf32>
    %38 = arith.addf %34, %37 : vector<2x128xf32>
    %c0_31 = arith.constant 0 : index
    %c0_32 = arith.constant 0 : index
    %c0_33 = arith.constant 0 : index
    %39 = vector.load %arg10[%c0_31, %c0_32, %c0_33] : memref<1x2x128xf32, #tpu.memory_space<vmem>>, vector<1x2x128xf32>
    %40 = vector.shape_cast %39 : vector<1x2x128xf32> to vector<2x128xf32>
    %41 = vector.shape_cast %38 : vector<2x128xf32> to vector<1x2x128xf32>
    tpu.vector_store %arg10[%c0_31, %c0_32, %c0_33], %41 {strides = array<i32>} : memref<1x2x128xf32, #tpu.memory_space<vmem>>, vector<1x2x128xf32>,
    return
  }
  func.func @transform_0(%arg0: i32) -> (i32, i32) {
    %c0_i32 = arith.constant 0 : i32
    %c0_i32_0 = arith.constant 0 : i32
    %c0_i32_1 = arith.constant 0 : i32
    return %c0_i32, %c0_i32_0 : i32, i32
  }
  func.func @transform_1(%arg0: i32) -> (i32, i32, i32) {
    %c0_i32 = arith.constant 0 : i32
    %c0_i32_0 = arith.constant 0 : i32
    %c0_i32_1 = arith.constant 0 : i32
    return %arg0, %c0_i32, %c0_i32_0 : i32, i32, i32
  }
  func.func @transform_2(%arg0: i32) -> (i32, i32, i32) {
    %c0_i32 = arith.constant 0 : i32
    %c0_i32_0 = arith.constant 0 : i32
    %c0_i32_1 = arith.constant 0 : i32
    return %arg0, %c0_i32, %c0_i32_0 : i32, i32, i32
  }
  func.func @transform_3(%arg0: i32) -> (i32, i32, i32) {
    %c0_i32 = arith.constant 0 : i32
    %c0_i32_0 = arith.constant 0 : i32
    %c0_i32_1 = arith.constant 0 : i32
    return %arg0, %c0_i32, %c0_i32_0 : i32, i32, i32
  }
  func.func @transform_4(%arg0: i32) -> (i32, i32, i32) {
    %c0_i32 = arith.constant 0 : i32
    %c0_i32_0 = arith.constant 0 : i32
    %c0_i32_1 = arith.constant 0 : i32
    return %arg0, %c0_i32, %c0_i32_0 : i32, i32, i32
  }
  func.func @transform_5(%arg0: i32) -> (i32, i32, i32) {
    %c0_i32 = arith.constant 0 : i32
    %c0_i32_0 = arith.constant 0 : i32
    %c0_i32_1 = arith.constant 0 : i32
    return %arg0, %c0_i32, %c0_i32_0 : i32, i32, i32
  }
  func.func @transform_6(%arg0: i32) -> (i32, i32, i32) {
    %c0_i32 = arith.constant 0 : i32
    %c0_i32_0 = arith.constant 0 : i32
    %c0_i32_1 = arith.constant 0 : i32
    return %arg0, %c0_i32, %c0_i32_0 : i32, i32, i32
  }
  func.func @transform_7(%arg0: i32) -> (i32, i32, i32) {
    %c0_i32 = arith.constant 0 : i32
    %c0_i32_0 = arith.constant 0 : i32
    %c0_i32_1 = arith.constant 0 : i32
    return %arg0, %c0_i32, %c0_i32_0 : i32, i32, i32
  }
  func.func @transform_8(%arg0: i32) -> (i32, i32, i32) {
    %c0_i32 = arith.constant 0 : i32
    %c0_i32_0 = arith.constant 0 : i32
    %c0_i32_1 = arith.constant 0 : i32
    return %arg0, %c0_i32, %c0_i32_0 : i32, i32, i32
  }
  func.func @transform_9(%arg0: i32) -> (i32, i32, i32) {
    %c0_i32 = arith.constant 0 : i32
    %c0_i32_0 = arith.constant 0 : i32
    %c0_i32_1 = arith.constant 0 : i32
    return %arg0, %c0_i32, %c0_i32_0 : i32, i32, i32
  }
}

</mosaic_0001>

<bundles_post_ra>
// kernel: multi_head_forward.1
= control target key start
LH: loop header
LB: loop body
LE: loop exit
PB: predicated region body
PF: predicated region fallthrough
CT: control target
= control target key end

     0   :  { %s4889_s0 = inlined_call_operand.hbm [shape: f32[2,768], index: 0, kind: input, shape index: {}]   ;;  %s4890_s1 = inlined_call_operand.hbm [shape: bf16[3,768,512], index: 1, kind: input, shape index: {}]   ;;  %s4891_s2 = inlined_call_operand.hbm [shape: f32[3,1,512], index: 2, kind: input, shape index: {}]   ;;  %s4892_s3 = inlined_call_operand.hbm [shape: bf16[3,512,256], index: 3, kind: input, shape index: {}]   ;;  %s4893_s4 = inlined_call_operand.hbm [shape: f32[3,1,256], index: 4, kind: input, shape index: {}]   ;;  %s4894_s5 = inlined_call_operand.hbm [shape: bf16[3,256,128], index: 5, kind: input, shape index: {}]   ;;  %s4895_s6 = inlined_call_operand.hbm [shape: f32[3,1,128], index: 6, kind: input, shape index: {}]   ;;  %s4896_s7 = inlined_call_operand.vmem [shape: bf16[3,128,128], index: 7, kind: input, shape index: {}]   ;;  %s4897_s8 = inlined_call_operand.vmem [shape: f32[3,1,128], index: 8, kind: input, shape index: {}]   ;;  %s4898_s9 = inlined_call_operand.vmem [shape: f32[3,2,128], index: 9, kind: output, shape index: {}]  }
   0x1   :  { %4910 = sst [smem:[#allocation19_spill]] %s4889_s0 }
   0x2   :  { %4911 = sst [smem:[#allocation20_spill]] %s4890_s1 }
   0x3   :  { %4912 = sst [smem:[#allocation21_spill]] %s4892_s3 }
   0x4   :  { %4913 = sst [smem:[#allocation22_spill]] %s4894_s5 }
   0x5   :  { %14 = vsyncpa [#allocation3], 0 }
   0x6   :  { %15 = vsyncpa [#allocation5], 0 }
   0x7   :  { %17 = vsyncpa [#allocation5 + $0x1], 0 }
   0x8   :  { %18 = vsyncpa [#allocation8], 0 }
   0x9   :  { %20 = vsyncpa [#allocation8 + $0x1], 0 }
   0xa   :  { %21 = vsyncpa [#allocation11], 0 }
   0xb   :  { %23 = vsyncpa [#allocation11 + $0x1], 0  ;;  %s4233_s30 = smov 0   ;;  %s4235_s10 = smov 0  }
   0xc   :  { %s4237_s11 = smov 0   ;;  %s4239_s12 = smov 0  }
   0xd LB: > { %4914 = sst [smem:[#allocation17_spill]] %s4161_s11  ;;  %s4254_s13 = sadd.s32 1, %s4165_s12   ;;  %s4165_s12 = sphi %s4239_s12, %s4940_s12   ;;  %s4161_s11 = sphi %s4237_s11, %s4937_s11   ;;  %s4157_s10 = sphi %s4235_s10, %s4939_s10   ;;  %s4153_s30 = sphi %s4233_s30, %s4938_s30  }
   0xe   : > { %s57_s14 = sadd.s32 1, %s4161_s11  ;;  %s54_s15 = ssub.s32 %s4165_s12, %s4254_s13 }
   0xf   : > { %p64_p0 = scmp.ne.s32.totalorder %s4161_s11, %s4157_s10  ;;  %p55_p1 = scmp.eq.s32.totalorder %s54_s15, 0 }
  0x10   : > { %p65_p2 = scmp.eq.s32.totalorder %s4165_s12, 0  ;;  %p3458_p3 = scmp.lt.s32.totalorder %s4165_s12, 3 }
  0x11   : > { %s4264_s16 = scalar_select %p55_p1, %s4161_s11, %s57_s14  }
  0x12   : > { %p66_p4 = por %p65_p2, %p64_p0  ;;  %s4267_s17 = sand.u32 1, %s4165_s12  }
  0x13   : > { %4915 = sst [smem:[#allocation18_spill]] %s4264_s16  ;;  %s4270_s18 = sand.u32 1, %s4161_s11  }
  0x14   : > { %s3415_s19 = smul.u32 1536, %s4270_s18  ;;  %p4273_p5 = pnand %p3458_p3, %p66_p4 }
  0x15   : > { %s3416_s21 = smul.u32 24576, %s4165_s12  ;;  %s4917_s1 = sld [smem:[#allocation20_spill]] }
  0x16   : > { %s4916_s20 = scalar_select %p4273_p5, 1, 0 }
  0x17   : > { %s317_s25 = scalar_lea.vmem [#allocation4], %s3415_s19  ;;  %s4900_s27 = scalar_lea.sflag [#allocation5], %s4267_s17 }
  0x18   : > { %s324_s26 = sshll.u32 %s317_s25, 4  ;;  %p4290_p7 = pneg %p4273_p5  ;;  %s4283_s26 = int_to_ptr.vmem [resolvable:$true] %s324_s26 }
  0x1a   : > { %s4918_s29 = scalar_select %p4290_p7, 1, 0 }
  0x1b   : > { %s4281_s24 = scalar_lea.hbm %s4917_s1, %s3416_s21  ;;  %s3916_s21 = scalar_lea.hbm %s4917_s1, 73728 }
  0x1c   : > { %s3911_s28 = scalar_lea.hbm %s4281_s24, 24576  ;;  %p3917_p10 = scmp.lt.u32.totalorder %s4281_s24, %s4917_s1 }
  0x1d   : > { %p3912_p6 = scmp.ne.s32.totalorder %s4281_s24, %s3911_s28  ;;  %p3918_p11 = scmp.lt.u32.totalorder %s3916_s21, %s3911_s28 }
  0x1e   : > { %p3920_p13 = scmp.lt.u32.totalorder %s3911_s28, %s4281_s24 }
  0x1f   : > { %p3914_p8 = pnand %p4290_p7, %p3912_p6  ;;  %p3919_p12 = por %p3918_p11, %p3917_p10 }
  0x21   : > { %p3915_p9 = pneg %p3914_p8  ;;  %p3921_p0 = por %p3920_p13, %p3919_p12 }
  0x23   : > { %p3922_p1 = pnand %p3921_p0, %p3915_p9 }
  0x25   : > { %3925 = shalt.err (!%p3922_p1)
}
  0x26   : > { %s3926_s23 = scalar_lea.vmem %s4283_s26, 24576  ;;  %s4167_s25 = smov [#allocation4]  }
  0x27   : > { %p3927_p2 = scmp.ne.s32.totalorder %s4283_s26, %s3926_s23  ;;  %s3931_s14 = sshll.u32 %s4167_s25, 4  ;;  %s3932_s14 = int_to_ptr.vmem [resolvable:$false] %s3931_s14 }
  0x28   : > { %s3933_s15 = scalar_lea.vmem %s3932_s14, 49152  ;;  %p3934_p6 = scmp.lt.s32.totalorder %s4283_s26, %s3932_s14 }
  0x29   : > { %p3929_p3 = pnand %p3927_p2, %p4290_p7  ;;  %p3935_p8 = scmp.lt.s32.totalorder %s3933_s15, %s3926_s23 }
  0x2b   : > { %p3930_p4 = pneg %p3929_p3  ;;  %p3936_p10 = por %p3935_p8, %p3934_p6 }
  0x2d   : > { %p3937_p11 = pnand %p3936_p10, %p3930_p4 }
  0x2f   : > { %3940 = shalt.err (!%p3937_p11)
}
  0x30   : > { %s4168_s28 = smov 256   ;;  %s4169_s21 = smov 16  }
  0x31   : > { %3441 = dma.hbm_to_vmem [thread:$0]  (!%p4273_p5), %s4281_s24, 24576, %s4283_s26, %s4900_s27, %s4168_s28, %s4168_s28, %s4169_s21  }
  0x32   : > { %s3029_s19 = sshll.u32 %s4270_s18, 9  ;;  %s3334_s22 = sshll.u32 %s4165_s12, 13 }
  0x33   : > { %s4919_s3 = sld [smem:[#allocation21_spill]]  ;;  %s357_s15 = scalar_lea.vmem [#allocation7], %s3029_s19 }
  0x34   : > { %s364_s1 = sshll.u32 %s357_s15, 4  ;;  %s4902_s16 = scalar_lea.sflag [#allocation8], %s4267_s17  ;;  %s4322_s1 = int_to_ptr.vmem [resolvable:$true] %s364_s1 }
  0x39   : > { %s4320_s14 = scalar_lea.hbm %s4919_s3, %s3334_s22  ;;  %s3946_s28 = scalar_lea.hbm %s4919_s3, 24576 }
  0x3a   : > { %s3941_s11 = scalar_lea.hbm %s4320_s14, 8192  ;;  %p3947_p0 = scmp.lt.u32.totalorder %s4320_s14, %s4919_s3 }
  0x3b   : > { %p3942_p9 = scmp.ne.s32.totalorder %s4320_s14, %s3941_s11  ;;  %p3948_p1 = scmp.lt.u32.totalorder %s3946_s28, %s3941_s11 }
  0x3c   : > { %p3950_p3 = scmp.lt.u32.totalorder %s3941_s11, %s4320_s14 }
  0x3d   : > { %p3944_p12 = pnand %p3942_p9, %p4290_p7  ;;  %p3949_p2 = por %p3948_p1, %p3947_p0 }
  0x3f   : > { %p3945_p13 = pneg %p3944_p12  ;;  %p3951_p4 = por %p3950_p3, %p3949_p2 }
  0x41   : > { %p3952_p6 = pnand %p3951_p4, %p3945_p13 }
  0x43   : > { %3955 = shalt.err (!%p3952_p6)
}
  0x44   : > { %s3956_s19 = scalar_lea.vmem %s4322_s1, 8192  ;;  %s4170_s25 = smov [#allocation7]  }
  0x45   : > { %p3957_p8 = scmp.ne.s32.totalorder %s4322_s1, %s3956_s19  ;;  %s3961_s23 = sshll.u32 %s4170_s25, 4  ;;  %s3962_s23 = int_to_ptr.vmem [resolvable:$false] %s3961_s23 }
  0x46   : > { %s3963_s15 = scalar_lea.vmem %s3962_s23, 16384  ;;  %p3964_p9 = scmp.lt.s32.totalorder %s4322_s1, %s3962_s23 }
  0x47   : > { %p3959_p10 = pnand %p3957_p8, %p4290_p7  ;;  %p3965_p12 = scmp.lt.s32.totalorder %s3963_s15, %s3956_s19 }
  0x49   : > { %p3960_p11 = pneg %p3959_p10  ;;  %p3966_p0 = por %p3965_p12, %p3964_p9 }
  0x4b   : > { %p3967_p1 = pnand %p3966_p0, %p3960_p11 }
  0x4d   : > { %3970 = shalt.err (!%p3967_p1)
}
  0x4e   : > { %s4171_s11 = smov 128   ;;  %s4172_s24 = smov 8  }
  0x4f   : > { %3447 = dma.hbm_to_vmem [thread:$0]  (!%p4273_p5), %s4320_s14, 8192, %s4322_s1, %s4902_s16, %s4171_s11, %s4171_s11, %s4172_s24  }
  0x50   : > { %s3035_s26 = sshll.u32 %s4270_s18, 7  ;;  %s3336_s28 = sshll.u32 %s4165_s12, 11 }
  0x51   : > { %s4920_s5 = sld [smem:[#allocation22_spill]]  ;;  %s397_s25 = scalar_lea.vmem [#allocation10], %s3035_s26 }
  0x52   : > { %s404_s23 = sshll.u32 %s397_s25, 4  ;;  %s4901_s15 = scalar_lea.sflag [#allocation11], %s4267_s17  ;;  %s4355_s23 = int_to_ptr.vmem [resolvable:$true] %s404_s23 }
  0x57   : > { %s4353_s19 = scalar_lea.hbm %s4920_s5, %s3336_s28  ;;  %s3976_s11 = scalar_lea.hbm %s4920_s5, 6144 }
  0x58   : > { %s3971_s27 = scalar_lea.hbm %s4353_s19, 2048  ;;  %p3977_p4 = scmp.lt.u32.totalorder %s4353_s19, %s4920_s5 }
  0x59   : > { %p3972_p13 = scmp.ne.s32.totalorder %s4353_s19, %s3971_s27  ;;  %p3978_p6 = scmp.lt.u32.totalorder %s3976_s11, %s3971_s27 }
  0x5a   : > { %p3980_p10 = scmp.lt.u32.totalorder %s3971_s27, %s4353_s19 }
  0x5b   : > { %p3974_p2 = pnand %p3972_p13, %p4290_p7  ;;  %p3979_p8 = por %p3978_p6, %p3977_p4 }
  0x5d   : > { %p3975_p3 = pneg %p3974_p2  ;;  %p3981_p11 = por %p3980_p10, %p3979_p8 }
  0x5f   : > { %p3982_p9 = pnand %p3981_p11, %p3975_p3 }
  0x61   : > { %3985 = shalt.err (!%p3982_p9)
}
  0x62   : > { %s3986_s26 = scalar_lea.vmem %s4355_s23, 2048  ;;  %s4173_s21 = smov [#allocation10]  }
  0x63   : > { %p3987_p12 = scmp.ne.s32.totalorder %s4355_s23, %s3986_s26  ;;  %s3991_s22 = sshll.u32 %s4173_s21, 4  ;;  %s3992_s22 = int_to_ptr.vmem [resolvable:$false] %s3991_s22 }
  0x64   : > { %s3993_s25 = scalar_lea.vmem %s3992_s22, 4096  ;;  %p3994_p13 = scmp.lt.s32.totalorder %s4355_s23, %s3992_s22 }
  0x65   : > { %p3989_p0 = pnand %p3987_p12, %p4290_p7  ;;  %p3995_p2 = scmp.lt.s32.totalorder %s3993_s25, %s3986_s26 }
  0x67   : > { %p3990_p1 = pneg %p3989_p0  ;;  %p3996_p4 = por %p3995_p2, %p3994_p13 }
  0x69   : > { %p3997_p6 = pnand %p3996_p4, %p3990_p1 }
  0x6b   : > { %4000 = shalt.err (!%p3997_p6)
}
  0x6c   : > { %s4174_s27 = smov 64   ;;  %s4175_s1 = smov 4  }
  0x6d   : > { %3453 = dma.hbm_to_vmem [thread:$0]  (!%p4273_p5), %s4353_s19, 2048, %s4355_s23, %s4901_s15, %s4174_s27, %s4174_s27, %s4175_s1  }
  0x6e   : > { %s4382_s14 = sadd.s32 4294967295, %s4165_s12   ;;  %p70_p8 = scmp.ne.s32.totalorder %s4157_s10, %s4153_s30 }
  0x6f   : > { %p4903_p3 = scmp.eq.s32.totalorder %s4382_s14, 0  ;;  %p3022_p10 = scmp.ge.s32.totalorder %s4165_s12, 1 }
  0x70   : > { %p289_p11 = scmp.lt.s32.totalorder %s4165_s12, 4  ;;  %s4176_s19 = smov [#allocation2]  }
  0x71   : > { %p4391_p9 = por %p4903_p3, %p70_p8  ;;  %s302_s23 = sshll.u32 %s4176_s19, 4  ;;  %s303_s23 = int_to_ptr.vmem [resolvable:$true] %s302_s23 }
  0x72   : > { %p4395_p12 = pnand %p3022_p10, %p289_p11  ;;  %s3026_s28 = sshll.u32 %s4270_s18, 2 }
  0x73   : > { %s4921_s11 = scalar_select %p4391_p9, 1, 0 }
  0x74   : > { %s4922_s24 = scalar_select %p4395_p12, 1, 0 }
  0x75   : > { %p3434_p0 = pneg %p4395_p12  ;;  %s3333_s30 = sshll.u32 %s4165_s12, 6 }
  0x76   : > { %s338_s26 = scalar_lea.vmem [#allocation6], %s3026_s28  ;;  %s4412_s1 = scalar_lea.hbm %s4891_s2, %s3333_s30 }
  0x77   : > { %s346_s21 = sshll.u32 %s338_s26, 4  ;;  %p4405_p1 = pnand %p3434_p0, %p4903_p3  ;;  %s4414_s21 = int_to_ptr.vmem [resolvable:$true] %s346_s21 }
  0x78   : > { %s3032_s19 = sshll.u32 %s4270_s18, 1  ;;  %s4924_s0 = sld [smem:[#allocation19_spill]] }
  0x79   : > { %p4003_p2 = pneg %p4405_p1 }
  0x7e   : > { %s4001_s3 = scalar_lea.hbm %s4924_s0, 192 }
  0x7f   : > { %p4002_p13 = scmp.ne.s32.totalorder %s4924_s0, %s4001_s3  ;;  %p4008_p8 = scmp.lt.u32.totalorder %s4001_s3, %s4924_s0 }
  0x81   : > { %p4004_p4 = pnand %p4003_p2, %p4002_p13 }
  0x83   : > { %p4005_p6 = pneg %p4004_p4 }
  0x85   : > { %p4010_p10 = pnand %p4008_p8, %p4005_p6 }
  0x87   : > { %4013 = shalt.err (!%p4010_p10)
}
  0x88   : > { %s4014_s30 = scalar_lea.vmem %s303_s23, 192  ;;  %p4022_p9 = scmp.lt.s32.totalorder %s303_s23, %s303_s23 }
  0x89   : > { %p4015_p11 = scmp.ne.s32.totalorder %s303_s23, %s4014_s30  ;;  %p4023_p12 = scmp.lt.s32.totalorder %s4014_s30, %s4014_s30 }
  0x8b   : > { %p4017_p0 = pnand %p4015_p11, %p4003_p2  ;;  %p4024_p5 = por %p4023_p12, %p4022_p9 }
  0x8d   : > { %p4018_p3 = pneg %p4017_p0 }
  0x8f   : > { %p4025_p7 = pnand %p4024_p5, %p4018_p3 }
  0x91   : > { %4028 = shalt.err (!%p4025_p7)
}
  0x92   : > { %3437 = dma.hbm_to_vmem [thread:$0]  (!%p4405_p1), %s4924_s0, 192, %s303_s23, [#allocation3]  }
  0x93   : > { %s4029_s3 = scalar_lea.hbm %s4412_s1, 64  ;;  %p4925_p2 = scmp.ne.s32.totalorder %s4918_s29, 0 }
  0x94   : > { %p4030_p13 = scmp.ne.s32.totalorder %s4412_s1, %s4029_s3  ;;  %s4034_s28 = scalar_lea.hbm %s4891_s2, 192 }
  0x95   : > { %p4035_p5 = scmp.lt.u32.totalorder %s4412_s1, %s4891_s2  ;;  %p4036_p7 = scmp.lt.u32.totalorder %s4034_s28, %s4029_s3 }
  0x96   : > { %p4032_p4 = pnand %p4030_p13, %p4925_p2  ;;  %p4038_p9 = scmp.lt.u32.totalorder %s4029_s3, %s4412_s1 }
  0x97   : > { %p4037_p3 = por %p4036_p7, %p4035_p5 }
  0x98   : > { %p4033_p6 = pneg %p4032_p4 }
  0x99   : > { %p4039_p12 = por %p4038_p9, %p4037_p3 }
  0x9b   : > { %p4040_p8 = pnand %p4039_p12, %p4033_p6 }
  0x9d   : > { %4043 = shalt.err (!%p4040_p8)
}
  0x9e   : > { %s4044_s23 = scalar_lea.vmem %s4414_s21, 64  ;;  %s4177_s25 = smov [#allocation6]  }
  0x9f   : > { %p4045_p1 = scmp.ne.s32.totalorder %s4414_s21, %s4044_s23  ;;  %s4049_s30 = sshll.u32 %s4177_s25, 4  ;;  %s4050_s30 = int_to_ptr.vmem [resolvable:$false] %s4049_s30 }
  0xa0   : > { %s4051_s16 = scalar_lea.vmem %s4050_s30, 128  ;;  %p4052_p0 = scmp.lt.s32.totalorder %s4414_s21, %s4050_s30 }
  0xa1   : > { %p4047_p10 = pnand %p4045_p1, %p4925_p2  ;;  %p4053_p13 = scmp.lt.s32.totalorder %s4051_s16, %s4044_s23 }
  0xa3   : > { %p4048_p11 = pneg %p4047_p10  ;;  %p4054_p4 = por %p4053_p13, %p4052_p0 }
  0xa5   : > { %p4055_p5 = pnand %p4054_p4, %p4048_p11 }
  0xa7   : > { %4058 = shalt.err (!%p4055_p5)
}
  0xa8   : > { %p4926_p6 = scmp.ne.s32.totalorder %s4916_s20, 0  ;;  %s4927_s15 = scalar_lea.sflag [#allocation5], %s4267_s17 }
  0xa9   : > { %s3335_s3 = sshll.u32 %s4165_s12, 5  ;;  %s378_s5 = scalar_lea.vmem [#allocation9], %s3032_s19 }
  0xaa   : > { %3444 = dma.hbm_to_vmem [thread:$0]  (!%p4926_p6), %s4412_s1, 64, %s4414_s21, %s4927_s15  }
  0xab   : > { %s386_s27 = sshll.u32 %s378_s5, 4  ;;  %s384_s22 = scalar_lea.hbm %s4893_s4, %s3335_s3  ;;  %s387_s27 = int_to_ptr.vmem [resolvable:$true] %s386_s27 }
  0xac   : > { %s4059_s23 = scalar_lea.hbm %s384_s22, 32  ;;  %s4064_s16 = scalar_lea.hbm %s4893_s4, 96 }
  0xad   : > { %p4060_p7 = scmp.ne.s32.totalorder %s384_s22, %s4059_s23  ;;  %p4065_p12 = scmp.lt.u32.totalorder %s384_s22, %s4893_s4 }
  0xae   : > { %p4066_p8 = scmp.lt.u32.totalorder %s4064_s16, %s4059_s23  ;;  %p4068_p10 = scmp.lt.u32.totalorder %s4059_s23, %s384_s22 }
  0xaf   : > { %p4062_p3 = pnand %p4060_p7, %p4925_p2 }
  0xb0   : > { %p4067_p1 = por %p4066_p8, %p4065_p12 }
  0xb1   : > { %p4063_p9 = pneg %p4062_p3 }
  0xb2   : > { %p4069_p11 = por %p4068_p10, %p4067_p1 }
  0xb4   : > { %p4070_p0 = pnand %p4069_p11, %p4063_p9 }
  0xb6   : > { %4073 = shalt.err (!%p4070_p0)
}
  0xb7   : > { %s4074_s1 = scalar_lea.vmem %s387_s27, 32  ;;  %s4178_s19 = smov [#allocation9]  }
  0xb8   : > { %p4075_p13 = scmp.ne.s32.totalorder %s387_s27, %s4074_s1  ;;  %s4079_s15 = sshll.u32 %s4178_s19, 4  ;;  %s4080_s15 = int_to_ptr.vmem [resolvable:$false] %s4079_s15 }
  0xb9   : > { %s4081_s3 = scalar_lea.vmem %s4080_s15, 64  ;;  %p4082_p7 = scmp.lt.s32.totalorder %s387_s27, %s4080_s15 }
  0xba   : > { %p4077_p4 = pnand %p4075_p13, %p4925_p2  ;;  %p4083_p3 = scmp.lt.s32.totalorder %s4081_s3, %s4074_s1 }
  0xbc   : > { %p4078_p5 = pneg %p4077_p4  ;;  %p4084_p6 = por %p4083_p3, %p4082_p7 }
  0xbe   : > { %p4085_p8 = pnand %p4084_p6, %p4078_p5 }
  0xc0   : > { %4088 = shalt.err (!%p4085_p8)
}
  0xc1   : > { %p4928_p12 = scmp.ne.s32.totalorder %s4916_s20, 0  ;;  %s4929_s0 = scalar_lea.sflag [#allocation8], %s4267_s17 }
  0xc2   : > { %s3038_s5 = sshll.u32 %s4165_s12, 4  ;;  %s417_s25 = scalar_lea.vmem [#allocation12], %s4270_s18 }
  0xc3   : > { %3450 = dma.hbm_to_vmem [thread:$0]  (!%p4928_p12), %s384_s22, 32, %s387_s27, %s4929_s0  }
  0xc4   : > { %s4480_s23 = scalar_lea.hbm %s4895_s6, %s3038_s5  ;;  %s424_s30 = sshll.u32 %s417_s25, 4  ;;  %s425_s30 = int_to_ptr.vmem [resolvable:$true] %s424_s30 }
  0xc5   : > { %s4089_s16 = scalar_lea.hbm %s4480_s23, 16  ;;  %s4094_s12 = scalar_lea.hbm %s4895_s6, 48 }
  0xc6   : > { %p4090_p6 = scmp.ne.s32.totalorder %s4480_s23, %s4089_s16  ;;  %p4095_p10 = scmp.lt.u32.totalorder %s4480_s23, %s4895_s6 }
  0xc7   : > { %p4096_p11 = scmp.lt.u32.totalorder %s4094_s12, %s4089_s16  ;;  %p4098_p13 = scmp.lt.u32.totalorder %s4089_s16, %s4480_s23 }
  0xc8   : > { %p4092_p9 = pnand %p4090_p6, %p4925_p2 }
  0xc9   : > { %p4097_p0 = por %p4096_p11, %p4095_p10 }
  0xca   : > { %p4093_p1 = pneg %p4092_p9 }
  0xcb   : > { %p4099_p4 = por %p4098_p13, %p4097_p0 }
  0xcd   : > { %p4100_p5 = pnand %p4099_p4, %p4093_p1 }
  0xcf   : > { %4103 = shalt.err (!%p4100_p5)
}
  0xd0   : > { %s4104_s18 = scalar_lea.vmem %s425_s30, 16  ;;  %s4179_s19 = smov [#allocation12]  }
  0xd1   : > { %p4105_p7 = scmp.ne.s32.totalorder %s425_s30, %s4104_s18  ;;  %s4109_s15 = sshll.u32 %s4179_s19, 4  ;;  %s4110_s15 = int_to_ptr.vmem [resolvable:$false] %s4109_s15 }
  0xd2   : > { %s4111_s3 = scalar_lea.vmem %s4110_s15, 32  ;;  %p4112_p6 = scmp.lt.s32.totalorder %s425_s30, %s4110_s15 }
  0xd3   : > { %p4107_p3 = pnand %p4105_p7, %p4925_p2  ;;  %p4113_p9 = scmp.lt.s32.totalorder %s4111_s3, %s4104_s18 }
  0xd5   : > { %p4108_p8 = pneg %p4107_p3  ;;  %p4114_p12 = por %p4113_p9, %p4112_p6 }
  0xd7   : > { %p4115_p10 = pnand %p4114_p12, %p4108_p8 }
  0xd9   : > { %4118 = shalt.err (!%p4115_p10)
}
  0xda   : > { %p4930_p11 = scmp.ne.s32.totalorder %s4916_s20, 0  ;;  %s4931_s0 = scalar_lea.sflag [#allocation11], %s4267_s17 }
  0xdb   : > { %p4932_p1 = scmp.ne.s32.totalorder %s4922_s24, 0 }
  0xdc   : > { %3456 = dma.hbm_to_vmem [thread:$0]  (!%p4930_p11), %s4480_s23, 16, %s425_s30, %s4931_s0  }
  0xdd   : > { %447 = sbr.rel (%p4932_p1) target bundleno = 1375 (0x55f), region = 56  ;;  %p4933_p2 = scmp.eq.s32.totalorder (!%p4932_p1), %s4382_s14, 0 }
  0xe4   : > { %4136 = dma.done.wait (%p4933_p2), [#allocation3], 192   ;;  %p4934_p0 = pmov %p4933_p2 }
  0xe5   : > { %s453_s29 = sand.u32 1, %s4382_s14   ;;  %s4510_s5 = sand.u32 1, %s4157_s10  }
  0xe6   : > { %4138 = vsyncadd (%p4934_p0), [#allocation3], 4294967104  ;;  %s3417_s20 = smul.u32 1536, %s4510_s5  ;;  %s454_s17 = scalar_lea.sflag [#allocation5], %s453_s29 }
  0xe7   : > { %p4935_p12 = scmp.ne.s32.totalorder %s4921_s11, 0 }
  0xe8   : > { %s4513_s28 = scalar_lea.vmem [#allocation4], %s3417_s20 }
  0xe9   : > { %4140 = dma.done.wait (%p4935_p12), %s454_s17, 24640  }
  0xea   : > { %4142 = vsyncadd (%p4935_p12), %s454_s17, 4294942656  ;;  %s3041_s24 = sshll.u32 %s4510_s5, 2  ;;  %s3042_s26 = sshll.u32 %s4510_s5, 9 }
  0xeb   : > { %s4521_s23 = scalar_lea.vmem [#allocation6], %s3041_s24  ;;  %s472_s25 = scalar_lea.sflag [#allocation8], %s453_s29 }
  0xec   : > { %s4523_s30 = scalar_lea.vmem [#allocation7], %s3042_s26 }
  0xed   : > { %4144 = dma.done.wait (%p4935_p12), %s472_s25, 8224  }
  0xee   : > { %4146 = vsyncadd (%p4935_p12), %s472_s25, 4294959072  ;;  %s3043_s16 = sshll.u32 %s4510_s5, 1  ;;  %s3044_s21 = sshll.u32 %s4510_s5, 7 }
  0xef   : > { %s4531_s27 = scalar_lea.vmem [#allocation9], %s3043_s16  ;;  %s490_s12 = scalar_lea.sflag [#allocation11], %s453_s29 }
  0xf0   : > { %s4533_s22 = scalar_lea.vmem [#allocation10], %s3044_s21 }
  0xf1   : > { %4148 = dma.done.wait (%p4935_p12), %s490_s12, 2064  }
  0xf2   : > { %4150 = vsyncadd (%p4935_p12), %s490_s12, 4294965232  ;;  %v3502_v0 = vld [vmem:[%s4513_s28 + $0x4] ss:$16 sps:$4 sm:$0xff]   ;;  %v3504_v1 = vld [vmem:[%s4513_s28 + $0xc] ss:$16 sps:$4 sm:$0xff]   ;;  %v588_v38 = vlaneseq  ;;  %p567_p13 = scmp.lt.s32.totalorder %s4382_s14, 2 }
  0xf3   : > { %1795 = vmatprep.subr.bf16.mxu0 %v3502_v0  ;;  %v3506_v2 = vld [vmem:[%s4513_s28] ss:$16 sps:$4 sm:$0xff]   ;;  %v3507_v3 = vld [vmem:[%s4513_s28 + $0x8] ss:$16 sps:$4 sm:$0xff]   ;;  %1918 = vmatprep.subr.bf16.mxu1 %v3504_v1  ;;  %v3508_v4 = vld [vmem:[%s4513_s28 + $0x24] ss:$16 sps:$4 sm:$0xff]  }
  0xf4   : > { %1796 = vmatpush1.bf16.msra.mxu0 %v3506_v2  ;;  %1919 = vmatpush1.bf16.msra.mxu1 %v3507_v3  ;;  %v3510_v5 = vld [vmem:[%s4513_s28 + $0x2c] ss:$16 sps:$4 sm:$0xff]   ;;  %v3512_v6 = vld [vmem:[%s4513_s28 + $0x20] ss:$16 sps:$4 sm:$0xff]   ;;  %v3513_v7 = vld [vmem:[%s4513_s28 + $0x28] ss:$16 sps:$4 sm:$0xff]  }
  0xf5   : > { %1797 = vmatprep.subr.bf16.mxu0 %v3508_v4  ;;  %1920 = vmatprep.subr.bf16.mxu1 %v3510_v5  ;;  %v3514_v8 = vld [vmem:[%s4513_s28 + $0x44] ss:$16 sps:$4 sm:$0xff]   ;;  %v3516_v9 = vld [vmem:[%s4513_s28 + $0x4c] ss:$16 sps:$4 sm:$0xff]   ;;  %v3518_v10 = vld [vmem:[%s4513_s28 + $0x40] ss:$16 sps:$4 sm:$0xff]  }
  0xf6   : > { %v3519_v11 = vld [vmem:[%s4513_s28 + $0x48] ss:$16 sps:$4 sm:$0xff]   ;;  %v3520_v12 = vld [vmem:[%s4513_s28 + $0x64] ss:$16 sps:$4 sm:$0xff]   ;;  %v3522_v13 = vld [vmem:[%s4513_s28 + $0x6c] ss:$16 sps:$4 sm:$0xff]  }
  0xf7   : > { %v3524_v14 = vld [vmem:[%s4513_s28 + $0x60] ss:$16 sps:$4 sm:$0xff]   ;;  %v3525_v15 = vld [vmem:[%s4513_s28 + $0x68] ss:$16 sps:$4 sm:$0xff]   ;;  %v3526_v16 = vld [vmem:[%s4513_s28 + $0x84] ss:$16 sps:$4 sm:$0xff]  }
  0xf8   : > { %1798 = vmatpush1.bf16.msra.mxu0 %v3512_v6  ;;  %1921 = vmatpush1.bf16.msra.mxu1 %v3513_v7  ;;  %v3528_v17 = vld [vmem:[%s4513_s28 + $0x8c] ss:$16 sps:$4 sm:$0xff]   ;;  %v3530_v18 = vld [vmem:[%s4513_s28 + $0x80] ss:$16 sps:$4 sm:$0xff]   ;;  %v3531_v19 = vld [vmem:[%s4513_s28 + $0x88] ss:$16 sps:$4 sm:$0xff]  }
  0xf9   : > { %1799 = vmatprep.subr.bf16.mxu0 %v3514_v8  ;;  %1922 = vmatprep.subr.bf16.mxu1 %v3516_v9  ;;  %v3532_v20 = vld [vmem:[%s4513_s28 + $0xa4] ss:$16 sps:$4 sm:$0xff]   ;;  %v3534_v21 = vld [vmem:[%s4513_s28 + $0xac] ss:$16 sps:$4 sm:$0xff]   ;;  %v3536_v22 = vld [vmem:[%s4513_s28 + $0xa0] ss:$16 sps:$4 sm:$0xff]  }
  0xfa   : > { %v3537_v23 = vld [vmem:[%s4513_s28 + $0xa8] ss:$16 sps:$4 sm:$0xff]   ;;  %v3538_v24 = vld [vmem:[%s4513_s28 + $0xc4] ss:$16 sps:$4 sm:$0xff]   ;;  %v3540_v25 = vld [vmem:[%s4513_s28 + $0xcc] ss:$16 sps:$4 sm:$0xff]  }
  0xfb   : > { %v3542_v26 = vld [vmem:[%s4513_s28 + $0xc0] ss:$16 sps:$4 sm:$0xff]   ;;  %v3543_v27 = vld [vmem:[%s4513_s28 + $0xc8] ss:$16 sps:$4 sm:$0xff]   ;;  %v3544_v28 = vld [vmem:[%s4513_s28 + $0xe4] ss:$16 sps:$4 sm:$0xff]  }
  0xfc   : > { %1800 = vmatpush1.bf16.msra.mxu0 %v3518_v10  ;;  %1923 = vmatpush1.bf16.msra.mxu1 %v3519_v11  ;;  %v3546_v29 = vld [vmem:[%s4513_s28 + $0xec] ss:$16 sps:$4 sm:$0xff]   ;;  %v3548_v30 = vld [vmem:[%s4513_s28 + $0xe0] ss:$16 sps:$4 sm:$0xff]   ;;  %v3549_v31 = vld [vmem:[%s4513_s28 + $0xe8] ss:$16 sps:$4 sm:$0xff]  }
  0xfd   : > { %1801 = vmatprep.subr.bf16.mxu0 %v3520_v12  ;;  %1924 = vmatprep.subr.bf16.mxu1 %v3522_v13  ;;  %v3550_v32 = vld [vmem:[%s4513_s28 + $0x104] ss:$16 sps:$4 sm:$0xff]   ;;  %v3552_v33 = vld [vmem:[%s4513_s28 + $0x10c] ss:$16 sps:$4 sm:$0xff]   ;;  %v3554_v34 = vld [vmem:[%s4513_s28 + $0x100] ss:$16 sps:$4 sm:$0xff]  }
  0xfe   : > { %v3555_v35 = vld [vmem:[%s4513_s28 + $0x108] ss:$16 sps:$4 sm:$0xff]   ;;  %v4180_v36 = vmov 1983009808   ;;  %v3556_v39 = vld [vmem:[%s4513_s28 + $0x124] ss:$16 sps:$4 sm:$0xff]  }
  0xff   : > { %v586_v37 = vunpack.c.l.s4 %v4180_v36  ;;  %v3558_v40 = vld [vmem:[%s4513_s28 + $0x12c] ss:$16 sps:$4 sm:$0xff]   ;;  %v3560_v41 = vld [vmem:[%s4513_s28 + $0x120] ss:$16 sps:$4 sm:$0xff]   ;;  %v4578_v43 = vshrl.u32 %v588_v38, 7  ;;  %v580_v52 = vld [vmem:[#allocation2] sm:$0xff] }
 0x100   : > { %1802 = vmatpush1.bf16.msra.mxu0 %v3524_v14  ;;  %1925 = vmatpush1.bf16.msra.mxu1 %v3525_v15  ;;  %v3561_v44 = vld [vmem:[%s4513_s28 + $0x128] ss:$16 sps:$4 sm:$0xff]   ;;  %v3562_v45 = vld [vmem:[%s4513_s28 + $0x144] ss:$16 sps:$4 sm:$0xff]   ;;  %v3564_v46 = vld [vmem:[%s4513_s28 + $0x14c] ss:$16 sps:$4 sm:$0xff]   ;;  %v584_v4 = vcombine.high %v580_v52, %v580_v52 }
 0x101   : > { %1803 = vmatprep.subr.bf16.mxu0 %v3526_v16  ;;  %1926 = vmatprep.subr.bf16.mxu1 %v3528_v17  ;;  %v587_v42 = vunpack.c.0.s8 %v586_v37  ;;  %v3566_v47 = vld [vmem:[%s4513_s28 + $0x140] ss:$16 sps:$4 sm:$0xff]   ;;  %v3567_v48 = vld [vmem:[%s4513_s28 + $0x148] ss:$16 sps:$4 sm:$0xff]   ;;  %v3568_v50 = vld [vmem:[%s4513_s28 + $0x164] ss:$16 sps:$4 sm:$0xff]  }
 0x102   : > { %v3570_v51 = vld [vmem:[%s4513_s28 + $0x16c] ss:$16 sps:$4 sm:$0xff]   ;;  %v3572_v53 = vld [vmem:[%s4513_s28 + $0x160] ss:$16 sps:$4 sm:$0xff]   ;;  %v3573_v55 = vld [vmem:[%s4513_s28 + $0x168] ss:$16 sps:$4 sm:$0xff]  }
 0x103   : > { %v590_v49 = vsub.s32 %v587_v42, %v4578_v43  ;;  %v3574_v56 = vld [vmem:[%s4513_s28 + $0x184] ss:$16 sps:$4 sm:$0xff]   ;;  %v3576_v57 = vld [vmem:[%s4513_s28 + $0x18c] ss:$16 sps:$4 sm:$0xff]   ;;  %v3578_v59 = vld [vmem:[%s4513_s28 + $0x180] ss:$16 sps:$4 sm:$0xff]  }
 0x104   : > { %1804 = vmatpush1.bf16.msra.mxu0 %v3530_v18  ;;  %1927 = vmatpush1.bf16.msra.mxu1 %v3531_v19  ;;  %v3579_v61 = vld [vmem:[%s4513_s28 + $0x188] ss:$16 sps:$4 sm:$0xff]   ;;  %v3580_v62 = vld [vmem:[%s4513_s28 + $0x1a4] ss:$16 sps:$4 sm:$0xff]   ;;  %v3582_v63 = vld [vmem:[%s4513_s28 + $0x1ac] ss:$16 sps:$4 sm:$0xff]  }
 0x105   : > { %1805 = vmatprep.subr.bf16.mxu0 %v3532_v20  ;;  %1928 = vmatprep.subr.bf16.mxu1 %v3534_v21  ;;  %v591_v54 = vrot.slane %v580_v52, %v590_v49  ;;  %v3584_v0 = vld [vmem:[%s4513_s28 + $0x1a0] ss:$16 sps:$4 sm:$0xff]   ;;  %v3585_v1 = vld [vmem:[%s4513_s28 + $0x1a8] ss:$16 sps:$4 sm:$0xff]   ;;  %v3586_v2 = vld [vmem:[%s4513_s28 + $0x1c4] ss:$16 sps:$4 sm:$0xff]   ;;  %v4604_v9 = vrot.slane %v584_v4, %v590_v49 }
 0x106   : > { %v3588_v3 = vld [vmem:[%s4513_s28 + $0x1cc] ss:$16 sps:$4 sm:$0xff]   ;;  %v3590_v5 = vld [vmem:[%s4513_s28 + $0x1c0] ss:$16 sps:$4 sm:$0xff]   ;;  %v3591_v6 = vld [vmem:[%s4513_s28 + $0x1c8] ss:$16 sps:$4 sm:$0xff]  }
 0x107   : > { %v599_v58 = vcombine.high %v591_v54, %v591_v54  ;;  %v3592_v7 = vld [vmem:[%s4513_s28 + $0x1e4] ss:$16 sps:$4 sm:$0xff]   ;;  %v3594_v8 = vld [vmem:[%s4513_s28 + $0x1ec] ss:$16 sps:$4 sm:$0xff]   ;;  %v3596_v10 = vld [vmem:[%s4513_s28 + $0x1e0] ss:$16 sps:$4 sm:$0xff]   ;;  %v600_v14 = vcombine.high %v4604_v9, %v4604_v9  ;;  %v615_v16 = vpack.c.bf16 %v591_v54, %v591_v54 }
 0x108   : > { %1806 = vmatpush1.bf16.msra.mxu0 %v3536_v22  ;;  %1929 = vmatpush1.bf16.msra.mxu1 %v3537_v23  ;;  %v3597_v11 = vld [vmem:[%s4513_s28 + $0x1e8] ss:$16 sps:$4 sm:$0xff]   ;;  %v3601_v12 = vld [vmem:[%s4513_s28 + $0x204] ss:$16 sps:$4 sm:$0xff]   ;;  %v3604_v13 = vld [vmem:[%s4513_s28 + $0x20c] ss:$16 sps:$4 sm:$0xff]  }
 0x109   : > { %1807 = vmatprep.subr.bf16.mxu0 %v3538_v24  ;;  %1930 = vmatprep.subr.bf16.mxu1 %v3540_v25  ;;  %v616_v60 = vpack.c.bf16 %v599_v58, %v599_v58  ;;  %v3599_v15 = vld [vmem:[%s4513_s28 + $0x200] ss:$16 sps:$4 sm:$0xff]   ;;  %v3602_v17 = vld [vmem:[%s4513_s28 + $0x208] ss:$16 sps:$4 sm:$0xff]   ;;  %v3607_v18 = vld [vmem:[%s4513_s28 + $0x224] ss:$16 sps:$4 sm:$0xff]   ;;  %v618_v20 = vpack.c.bf16 %v600_v14, %v600_v14 }
 0x10a   : > { %v3610_v19 = vld [vmem:[%s4513_s28 + $0x22c] ss:$16 sps:$4 sm:$0xff]   ;;  %v3605_v21 = vld [vmem:[%s4513_s28 + $0x220] ss:$16 sps:$4 sm:$0xff]   ;;  %v3608_v22 = vld [vmem:[%s4513_s28 + $0x228] ss:$16 sps:$4 sm:$0xff]  }
 0x10b   : > { %1827 = vmatprep.mubr.bf16.mxu0 %v616_v60  ;;  %1950 = vmatprep.mubr.bf16.mxu1 %v616_v60  ;;  %v3613_v23 = vld [vmem:[%s4513_s28 + $0x244] ss:$16 sps:$4 sm:$0xff]   ;;  %v3616_v24 = vld [vmem:[%s4513_s28 + $0x24c] ss:$16 sps:$4 sm:$0xff]   ;;  %v3611_v25 = vld [vmem:[%s4513_s28 + $0x240] ss:$16 sps:$4 sm:$0xff]  }
 0x10c   : > { %1808 = vmatpush1.bf16.msra.mxu0 %v3542_v26  ;;  %1931 = vmatpush1.bf16.msra.mxu1 %v3543_v27  ;;  %v3614_v26 = vld [vmem:[%s4513_s28 + $0x248] ss:$16 sps:$4 sm:$0xff]   ;;  %v3619_v27 = vld [vmem:[%s4513_s28 + $0x264] ss:$16 sps:$4 sm:$0xff]   ;;  %v3634_v36 = vld [vmem:[%s4513_s28 + $0x2ac] ss:$16 sps:$4 sm:$0xff]  }
 0x10d   : > { %1809 = vmatprep.subr.bf16.mxu0 %v3544_v28  ;;  %1932 = vmatprep.subr.bf16.mxu1 %v3546_v29  ;;  %v3622_v28 = vld [vmem:[%s4513_s28 + $0x26c] ss:$16 sps:$4 sm:$0xff]   ;;  %v3617_v29 = vld [vmem:[%s4513_s28 + $0x260] ss:$16 sps:$4 sm:$0xff]   ;;  %v3632_v38 = vld [vmem:[%s4513_s28 + $0x2a8] ss:$16 sps:$4 sm:$0xff]  }
 0x10e   : > { %v3629_v37 = vld [vmem:[%s4513_s28 + $0x2a0] ss:$16 sps:$4 sm:$0xff]   ;;  %v3638_v42 = vld [vmem:[%s4513_s28 + $0x2c8] ss:$16 sps:$4 sm:$0xff]   ;;  %v3652_v49 = vld [vmem:[%s4513_s28 + $0x30c] ss:$16 sps:$4 sm:$0xff]  }
 0x10f   : > { %v3655_v52 = vld [vmem:[%s4513_s28 + $0x324] ss:$16 sps:$4 sm:$0xff]   ;;  %v3653_v54 = vld [vmem:[%s4513_s28 + $0x320] ss:$16 sps:$4 sm:$0xff]   ;;  %v3694_v14 = vld [vmem:[%s4513_s28 + $0x3ec] ss:$16 sps:$4 sm:$0xff]  }
 0x110   : > { %1810 = vmatpush1.bf16.msra.mxu0 %v3548_v30  ;;  %1933 = vmatpush1.bf16.msra.mxu1 %v3549_v31  ;;  %v3620_v30 = vld [vmem:[%s4513_s28 + $0x268] ss:$16 sps:$4 sm:$0xff]   ;;  %v3625_v31 = vld [vmem:[%s4513_s28 + $0x284] ss:$16 sps:$4 sm:$0xff]   ;;  %v3659_v58 = vld [vmem:[%s4513_s28 + $0x340] ss:$16 sps:$4 sm:$0xff]  }
 0x111   : > { %1811 = vmatprep.subr.bf16.mxu0 %v3550_v32  ;;  %1934 = vmatprep.subr.bf16.mxu1 %v3552_v33  ;;  %v3628_v32 = vld [vmem:[%s4513_s28 + $0x28c] ss:$16 sps:$4 sm:$0xff]   ;;  %v3623_v33 = vld [vmem:[%s4513_s28 + $0x280] ss:$16 sps:$4 sm:$0xff]   ;;  %v3667_v60 = vld [vmem:[%s4513_s28 + $0x364] ss:$16 sps:$4 sm:$0xff]  }
 0x112   : > { %v3679_v4 = vld [vmem:[%s4513_s28 + $0x3a4] ss:$16 sps:$4 sm:$0xff]   ;;  %s4942_s14 = smov (!%p567_p13, %s4382_s14), 2  ;;  %vm4182_vm0 = vmmov 0   ;;  %s501_s15 = scalar_lea.vmem [#allocation12], %s4510_s5 }
 0x113   : > { %s3337_s11 = sshll.u32 %s4942_s14, 6  ;;  %s574_s29 = scalar_lea.vmem %s4897_s8, %s4942_s14 }
 0x114   : > { %1812 = vmatpush1.bf16.msra.mxu0 %v3554_v34  ;;  %1935 = vmatpush1.bf16.msra.mxu1 %v3555_v35  ;;  %v3626_v34 = vld [vmem:[%s4513_s28 + $0x288] ss:$16 sps:$4 sm:$0xff]   ;;  %v3631_v35 = vld [vmem:[%s4513_s28 + $0x2a4] ss:$16 sps:$4 sm:$0xff]   ;;  %s4852_s19 = scalar_lea.vmem %s4896_s7, %s3337_s11  ;;  %s3047_s20 = sshll.u32 %s4942_s14, 1 }
 0x115   : > { %1813 = vmatprep.subr.bf16.mxu0 %v3556_v39  ;;  %1936 = vmatprep.subr.bf16.mxu1 %v3558_v40  ;;  %v3637_v39 = vld [vmem:[%s4513_s28 + $0x2c4] ss:$16 sps:$4 sm:$0xff]   ;;  %v3640_v40 = vld [vmem:[%s4513_s28 + $0x2cc] ss:$16 sps:$4 sm:$0xff]   ;;  %s578_s24 = scalar_lea.vmem %s4898_s9, %s3047_s20 }
 0x118   : > { %1814 = vmatpush1.bf16.msra.mxu0 %v3560_v41  ;;  %1937 = vmatpush1.bf16.msra.mxu1 %v3561_v44  ;;  %v3635_v41 = vld [vmem:[%s4513_s28 + $0x2c0] ss:$16 sps:$4 sm:$0xff]   ;;  %v3643_v44 = vld [vmem:[%s4513_s28 + $0x2e4] ss:$16 sps:$4 sm:$0xff]  }
 0x119   : > { %1815 = vmatprep.subr.bf16.mxu0 %v3562_v45  ;;  %1938 = vmatprep.subr.bf16.mxu1 %v3564_v46  ;;  %v3646_v45 = vld [vmem:[%s4513_s28 + $0x2ec] ss:$16 sps:$4 sm:$0xff]   ;;  %v3641_v46 = vld [vmem:[%s4513_s28 + $0x2e0] ss:$16 sps:$4 sm:$0xff]  }
 0x11c   : > { %1816 = vmatpush1.bf16.msra.mxu0 %v3566_v47  ;;  %1939 = vmatpush1.bf16.msra.mxu1 %v3567_v48  ;;  %v3644_v47 = vld [vmem:[%s4513_s28 + $0x2e8] ss:$16 sps:$4 sm:$0xff]   ;;  %v3649_v48 = vld [vmem:[%s4513_s28 + $0x304] ss:$16 sps:$4 sm:$0xff]  }
 0x11d   : > { %1817 = vmatprep.subr.bf16.mxu0 %v3568_v50  ;;  %1940 = vmatprep.subr.bf16.mxu1 %v3570_v51  ;;  %v3647_v50 = vld [vmem:[%s4513_s28 + $0x300] ss:$16 sps:$4 sm:$0xff]   ;;  %v3650_v51 = vld [vmem:[%s4513_s28 + $0x308] ss:$16 sps:$4 sm:$0xff]  }
 0x120   : > { %1818 = vmatpush1.bf16.msra.mxu0 %v3572_v53  ;;  %1941 = vmatpush1.bf16.msra.mxu1 %v3573_v55  ;;  %v3658_v53 = vld [vmem:[%s4513_s28 + $0x32c] ss:$16 sps:$4 sm:$0xff]   ;;  %v3656_v55 = vld [vmem:[%s4513_s28 + $0x328] ss:$16 sps:$4 sm:$0xff]  }
 0x121   : > { %1819 = vmatprep.subr.bf16.mxu0 %v3574_v56  ;;  %1942 = vmatprep.subr.bf16.mxu1 %v3576_v57  ;;  %v3661_v56 = vld [vmem:[%s4513_s28 + $0x344] ss:$16 sps:$4 sm:$0xff]   ;;  %v3664_v57 = vld [vmem:[%s4513_s28 + $0x34c] ss:$16 sps:$4 sm:$0xff]  }
 0x124   : > { %1820 = vmatpush1.bf16.msra.mxu0 %v3578_v59  ;;  %1943 = vmatpush1.bf16.msra.mxu1 %v3579_v61  ;;  %v3662_v59 = vld [vmem:[%s4513_s28 + $0x348] ss:$16 sps:$4 sm:$0xff]   ;;  %v3670_v61 = vld [vmem:[%s4513_s28 + $0x36c] ss:$16 sps:$4 sm:$0xff]  }
 0x125   : > { %1821 = vmatprep.subr.bf16.mxu0 %v3580_v62  ;;  %1944 = vmatprep.subr.bf16.mxu1 %v3582_v63  ;;  %v3665_v62 = vld [vmem:[%s4513_s28 + $0x360] ss:$16 sps:$4 sm:$0xff]   ;;  %v3668_v63 = vld [vmem:[%s4513_s28 + $0x368] ss:$16 sps:$4 sm:$0xff]  }
 0x128   : > { %1822 = vmatpush1.bf16.msra.mxu0 %v3584_v0  ;;  %1945 = vmatpush1.bf16.msra.mxu1 %v3585_v1  ;;  %v3673_v0 = vld [vmem:[%s4513_s28 + $0x384] ss:$16 sps:$4 sm:$0xff]   ;;  %v3676_v1 = vld [vmem:[%s4513_s28 + $0x38c] ss:$16 sps:$4 sm:$0xff]  }
 0x129   : > { %1823 = vmatprep.subr.bf16.mxu0 %v3586_v2  ;;  %1946 = vmatprep.subr.bf16.mxu1 %v3588_v3  ;;  %v3671_v2 = vld [vmem:[%s4513_s28 + $0x380] ss:$16 sps:$4 sm:$0xff]   ;;  %v3674_v3 = vld [vmem:[%s4513_s28 + $0x388] ss:$16 sps:$4 sm:$0xff]  }
 0x12c   : > { %1824 = vmatpush1.bf16.msra.mxu0 %v3590_v5  ;;  %1947 = vmatpush1.bf16.msra.mxu1 %v3591_v6  ;;  %v3682_v5 = vld [vmem:[%s4513_s28 + $0x3ac] ss:$16 sps:$4 sm:$0xff]   ;;  %v3677_v6 = vld [vmem:[%s4513_s28 + $0x3a0] ss:$16 sps:$4 sm:$0xff]  }
 0x12d   : > { %1825 = vmatprep.subr.bf16.mxu0 %v3592_v7  ;;  %1948 = vmatprep.subr.bf16.mxu1 %v3594_v8  ;;  %v3680_v7 = vld [vmem:[%s4513_s28 + $0x3a8] ss:$16 sps:$4 sm:$0xff]   ;;  %v3685_v8 = vld [vmem:[%s4513_s28 + $0x3c4] ss:$16 sps:$4 sm:$0xff]  }
 0x130   : > { %1826 = vmatpush1.bf16.msra.mxu0 %v3596_v10  ;;  %1949 = vmatpush1.bf16.msra.mxu1 %v3597_v11  ;;  %v3688_v10 = vld [vmem:[%s4513_s28 + $0x3cc] ss:$16 sps:$4 sm:$0xff]   ;;  %v3683_v11 = vld [vmem:[%s4513_s28 + $0x3c0] ss:$16 sps:$4 sm:$0xff]  }
 0x131   : > { %1836 = vmatprep.subr.bf16.mxu0 %v3601_v12  ;;  %1959 = vmatprep.subr.bf16.mxu1 %v3604_v13  ;;  %v3686_v12 = vld [vmem:[%s4513_s28 + $0x3c8] ss:$16 sps:$4 sm:$0xff]   ;;  %v3691_v13 = vld [vmem:[%s4513_s28 + $0x3e4] ss:$16 sps:$4 sm:$0xff]  }
 0x133   : > { %1828 = vmatmul.mubr.bf16.vlgmr.msra.gmra.mrb[0].mxu0 %v615_v16  ;;  %1951 = vmatmul.mubr.bf16.vlgmr.msra.gmra.mrb[0].mxu1 %v615_v16  ;;  %v3692_v16 = vld [vmem:[%s4513_s28 + $0x3e8] ss:$16 sps:$4 sm:$0xff]  }
 0x134   : > { %1837 = vmatpush1.bf16.msra.mxu0 %v3599_v15  ;;  %1960 = vmatpush1.bf16.msra.mxu1 %v3602_v17  ;;  %v3689_v15 = vld [vmem:[%s4513_s28 + $0x3e0] ss:$16 sps:$4 sm:$0xff]   ;;  %v3697_v17 = vld [vmem:[%s4513_s28 + $0x404] ss:$16 sps:$4 sm:$0xff]  }
 0x135   : > { %1838 = vmatprep.subr.bf16.mxu0 %v3607_v18  ;;  %1961 = vmatprep.subr.bf16.mxu1 %v3610_v19  ;;  %v3700_v18 = vld [vmem:[%s4513_s28 + $0x40c] ss:$16 sps:$4 sm:$0xff]   ;;  %v3695_v19 = vld [vmem:[%s4513_s28 + $0x400] ss:$16 sps:$4 sm:$0xff]  }
 0x136   : > { %1868 = vmatprep.mubr.bf16.mxu0 %v618_v20  ;;  %1991 = vmatprep.mubr.bf16.mxu1 %v618_v20  ;;  %v3698_v20 = vld [vmem:[%s4513_s28 + $0x408] ss:$16 sps:$4 sm:$0xff]  }
 0x138   : > { %1839 = vmatpush1.bf16.msra.mxu0 %v3605_v21  ;;  %1962 = vmatpush1.bf16.msra.mxu1 %v3608_v22  ;;  %v617_v21 = vpack.c.bf16 %v4604_v9, %v4604_v9  ;;  %v3703_v22 = vld [vmem:[%s4513_s28 + $0x424] ss:$16 sps:$4 sm:$0xff]  }
 0x139   : > { %1840 = vmatprep.subr.bf16.mxu0 %v3613_v23  ;;  %1963 = vmatprep.subr.bf16.mxu1 %v3616_v24  ;;  %v4681_v23 = vld.sshfl [vmem:[#allocation2 + $0x8] sm:$0x33 pattern:$0x76325410] }
 0x13a   : > { %v3706_v24 = vld [vmem:[%s4513_s28 + $0x42c] ss:$16 sps:$4 sm:$0xff]  }
 0x13c   : > { %1841 = vmatpush1.bf16.msra.mxu0 %v3611_v25  ;;  %1964 = vmatpush1.bf16.msra.mxu1 %v3614_v26  ;;  %v608_v25 = vcombine.high %v4681_v23, %v4681_v23  ;;  %v3701_v26 = vld [vmem:[%s4513_s28 + $0x420] ss:$16 sps:$4 sm:$0xff]  }
 0x13d   : > { %1842 = vmatprep.subr.bf16.mxu0 %v3619_v27  ;;  %1965 = vmatprep.subr.bf16.mxu1 %v3622_v28  ;;  %v3704_v27 = vld [vmem:[%s4513_s28 + $0x428] ss:$16 sps:$4 sm:$0xff]   ;;  %v3709_v28 = vld [vmem:[%s4513_s28 + $0x444] ss:$16 sps:$4 sm:$0xff]  }
 0x13e   : > { %v620_v9 = vpack.c.bf16 %v608_v25, %v608_v25  ;;  %v3791_v25 = vld [vmem:[%s4523_s30] ss:$8 sps:$4 sm:$0xff]  }
 0x140   : > { %1843 = vmatpush1.bf16.msra.mxu0 %v3617_v29  ;;  %1966 = vmatpush1.bf16.msra.mxu1 %v3620_v30  ;;  %v3712_v29 = vld [vmem:[%s4513_s28 + $0x44c] ss:$16 sps:$4 sm:$0xff]   ;;  %v3707_v30 = vld [vmem:[%s4513_s28 + $0x440] ss:$16 sps:$4 sm:$0xff]  }
 0x141   : > { %1844 = vmatprep.subr.bf16.mxu0 %v3625_v31  ;;  %1967 = vmatprep.subr.bf16.mxu1 %v3628_v32  ;;  %v3710_v31 = vld [vmem:[%s4513_s28 + $0x448] ss:$16 sps:$4 sm:$0xff]   ;;  %v3715_v32 = vld [vmem:[%s4513_s28 + $0x464] ss:$16 sps:$4 sm:$0xff]  }
 0x144   : > { %1845 = vmatpush1.bf16.msra.mxu0 %v3623_v33  ;;  %1968 = vmatpush1.bf16.msra.mxu1 %v3626_v34  ;;  %v3718_v33 = vld [vmem:[%s4513_s28 + $0x46c] ss:$16 sps:$4 sm:$0xff]   ;;  %v3713_v34 = vld [vmem:[%s4513_s28 + $0x460] ss:$16 sps:$4 sm:$0xff]  }
 0x145   : > { %1846 = vmatprep.subr.bf16.mxu0 %v3631_v35  ;;  %1969 = vmatprep.subr.bf16.mxu1 %v3634_v36  ;;  %v3716_v35 = vld [vmem:[%s4513_s28 + $0x468] ss:$16 sps:$4 sm:$0xff]   ;;  %v3721_v36 = vld [vmem:[%s4513_s28 + $0x484] ss:$16 sps:$4 sm:$0xff]  }
 0x148   : > { %1847 = vmatpush1.bf16.msra.mxu0 %v3629_v37  ;;  %1970 = vmatpush1.bf16.msra.mxu1 %v3632_v38  ;;  %v3724_v37 = vld [vmem:[%s4513_s28 + $0x48c] ss:$16 sps:$4 sm:$0xff]   ;;  %v3719_v38 = vld [vmem:[%s4513_s28 + $0x480] ss:$16 sps:$4 sm:$0xff]  }
 0x149   : > { %1848 = vmatprep.subr.bf16.mxu0 %v3637_v39  ;;  %1971 = vmatprep.subr.bf16.mxu1 %v3640_v40  ;;  %v3722_v39 = vld [vmem:[%s4513_s28 + $0x488] ss:$16 sps:$4 sm:$0xff]   ;;  %v3727_v40 = vld [vmem:[%s4513_s28 + $0x4a4] ss:$16 sps:$4 sm:$0xff]  }
 0x14c   : > { %1849 = vmatpush1.bf16.msra.mxu0 %v3635_v41  ;;  %1972 = vmatpush1.bf16.msra.mxu1 %v3638_v42  ;;  %v3730_v41 = vld [vmem:[%s4513_s28 + $0x4ac] ss:$16 sps:$4 sm:$0xff]   ;;  %v3725_v42 = vld [vmem:[%s4513_s28 + $0x4a0] ss:$16 sps:$4 sm:$0xff]  }
 0x14d   : > { %1850 = vmatprep.subr.bf16.mxu0 %v3643_v44  ;;  %1973 = vmatprep.subr.bf16.mxu1 %v3646_v45  ;;  %v3728_v44 = vld [vmem:[%s4513_s28 + $0x4a8] ss:$16 sps:$4 sm:$0xff]   ;;  %v3733_v45 = vld [vmem:[%s4513_s28 + $0x4c4] ss:$16 sps:$4 sm:$0xff]  }
 0x150   : > { %1851 = vmatpush1.bf16.msra.mxu0 %v3641_v46  ;;  %1974 = vmatpush1.bf16.msra.mxu1 %v3644_v47  ;;  %v3736_v46 = vld [vmem:[%s4513_s28 + $0x4cc] ss:$16 sps:$4 sm:$0xff]   ;;  %v3731_v47 = vld [vmem:[%s4513_s28 + $0x4c0] ss:$16 sps:$4 sm:$0xff]  }
 0x151   : > { %1852 = vmatprep.subr.bf16.mxu0 %v3649_v48  ;;  %1975 = vmatprep.subr.bf16.mxu1 %v3652_v49  ;;  %v3734_v48 = vld [vmem:[%s4513_s28 + $0x4c8] ss:$16 sps:$4 sm:$0xff]   ;;  %v3739_v49 = vld [vmem:[%s4513_s28 + $0x4e4] ss:$16 sps:$4 sm:$0xff]  }
 0x154   : > { %1853 = vmatpush1.bf16.msra.mxu0 %v3647_v50  ;;  %1976 = vmatpush1.bf16.msra.mxu1 %v3650_v51  ;;  %v3742_v50 = vld [vmem:[%s4513_s28 + $0x4ec] ss:$16 sps:$4 sm:$0xff]   ;;  %v3737_v51 = vld [vmem:[%s4513_s28 + $0x4e0] ss:$16 sps:$4 sm:$0xff]  }
 0x155   : > { %1854 = vmatprep.subr.bf16.mxu0 %v3655_v52  ;;  %1977 = vmatprep.subr.bf16.mxu1 %v3658_v53  ;;  %v3740_v52 = vld [vmem:[%s4513_s28 + $0x4e8] ss:$16 sps:$4 sm:$0xff]   ;;  %v3745_v53 = vld [vmem:[%s4513_s28 + $0x504] ss:$16 sps:$4 sm:$0xff]  }
 0x158   : > { %1855 = vmatpush1.bf16.msra.mxu0 %v3653_v54  ;;  %1978 = vmatpush1.bf16.msra.mxu1 %v3656_v55  ;;  %v3748_v54 = vld [vmem:[%s4513_s28 + $0x50c] ss:$16 sps:$4 sm:$0xff]   ;;  %v3743_v55 = vld [vmem:[%s4513_s28 + $0x500] ss:$16 sps:$4 sm:$0xff]  }
 0x159   : > { %1856 = vmatprep.subr.bf16.mxu0 %v3661_v56  ;;  %1979 = vmatprep.subr.bf16.mxu1 %v3664_v57  ;;  %v3746_v56 = vld [vmem:[%s4513_s28 + $0x508] ss:$16 sps:$4 sm:$0xff]   ;;  %v3751_v57 = vld [vmem:[%s4513_s28 + $0x524] ss:$16 sps:$4 sm:$0xff]  }
 0x15c   : > { %1857 = vmatpush1.bf16.msra.mxu0 %v3659_v58  ;;  %1980 = vmatpush1.bf16.msra.mxu1 %v3662_v59  ;;  %v3754_v58 = vld [vmem:[%s4513_s28 + $0x52c] ss:$16 sps:$4 sm:$0xff]   ;;  %v3749_v59 = vld [vmem:[%s4513_s28 + $0x520] ss:$16 sps:$4 sm:$0xff]  }
 0x15d   : > { %1858 = vmatprep.subr.bf16.mxu0 %v3667_v60  ;;  %1981 = vmatprep.subr.bf16.mxu1 %v3670_v61  ;;  %v3752_v60 = vld [vmem:[%s4513_s28 + $0x528] ss:$16 sps:$4 sm:$0xff]   ;;  %v3757_v61 = vld [vmem:[%s4513_s28 + $0x544] ss:$16 sps:$4 sm:$0xff]  }
 0x160   : > { %1859 = vmatpush1.bf16.msra.mxu0 %v3665_v62  ;;  %1982 = vmatpush1.bf16.msra.mxu1 %v3668_v63  ;;  %v3760_v62 = vld [vmem:[%s4513_s28 + $0x54c] ss:$16 sps:$4 sm:$0xff]   ;;  %v3755_v63 = vld [vmem:[%s4513_s28 + $0x540] ss:$16 sps:$4 sm:$0xff]  }
 0x161   : > { %1860 = vmatprep.subr.bf16.mxu0 %v3673_v0  ;;  %1983 = vmatprep.subr.bf16.mxu1 %v3676_v1  ;;  %v3758_v0 = vld [vmem:[%s4513_s28 + $0x548] ss:$16 sps:$4 sm:$0xff]   ;;  %v3763_v1 = vld [vmem:[%s4513_s28 + $0x564] ss:$16 sps:$4 sm:$0xff]  }
 0x164   : > { %1861 = vmatpush1.bf16.msra.mxu0 %v3671_v2  ;;  %1984 = vmatpush1.bf16.msra.mxu1 %v3674_v3  ;;  %v3766_v2 = vld [vmem:[%s4513_s28 + $0x56c] ss:$16 sps:$4 sm:$0xff]   ;;  %v3761_v3 = vld [vmem:[%s4513_s28 + $0x560] ss:$16 sps:$4 sm:$0xff]  }
 0x165   : > { %1862 = vmatprep.subr.bf16.mxu0 %v3679_v4  ;;  %1985 = vmatprep.subr.bf16.mxu1 %v3682_v5  ;;  %v3764_v4 = vld [vmem:[%s4513_s28 + $0x568] ss:$16 sps:$4 sm:$0xff]   ;;  %v3769_v5 = vld [vmem:[%s4513_s28 + $0x584] ss:$16 sps:$4 sm:$0xff]  }
 0x168   : > { %1863 = vmatpush1.bf16.msra.mxu0 %v3677_v6  ;;  %1986 = vmatpush1.bf16.msra.mxu1 %v3680_v7  ;;  %v3772_v6 = vld [vmem:[%s4513_s28 + $0x58c] ss:$16 sps:$4 sm:$0xff]   ;;  %v3767_v7 = vld [vmem:[%s4513_s28 + $0x580] ss:$16 sps:$4 sm:$0xff]  }
 0x169   : > { %1864 = vmatprep.subr.bf16.mxu0 %v3685_v8  ;;  %1987 = vmatprep.subr.bf16.mxu1 %v3688_v10  ;;  %v3770_v8 = vld [vmem:[%s4513_s28 + $0x588] ss:$16 sps:$4 sm:$0xff]   ;;  %v3775_v10 = vld [vmem:[%s4513_s28 + $0x5a4] ss:$16 sps:$4 sm:$0xff]  }
 0x16c   : > { %1865 = vmatpush1.bf16.msra.mxu0 %v3683_v11  ;;  %1988 = vmatpush1.bf16.msra.mxu1 %v3686_v12  ;;  %v3778_v11 = vld [vmem:[%s4513_s28 + $0x5ac] ss:$16 sps:$4 sm:$0xff]   ;;  %v3773_v12 = vld [vmem:[%s4513_s28 + $0x5a0] ss:$16 sps:$4 sm:$0xff]  }
 0x16d   : > { %1866 = vmatprep.subr.bf16.mxu0 %v3691_v13  ;;  %1989 = vmatprep.subr.bf16.mxu1 %v3694_v14  ;;  %v3776_v13 = vld [vmem:[%s4513_s28 + $0x5a8] ss:$16 sps:$4 sm:$0xff]   ;;  %v3781_v14 = vld [vmem:[%s4513_s28 + $0x5c4] ss:$16 sps:$4 sm:$0xff]  }
 0x170   : > { %1867 = vmatpush1.bf16.msra.mxu0 %v3689_v15  ;;  %1990 = vmatpush1.bf16.msra.mxu1 %v3692_v16  ;;  %v3784_v15 = vld [vmem:[%s4513_s28 + $0x5cc] ss:$16 sps:$4 sm:$0xff]   ;;  %v3779_v16 = vld [vmem:[%s4513_s28 + $0x5c0] ss:$16 sps:$4 sm:$0xff]  }
 0x171   : > { %1877 = vmatprep.subr.bf16.mxu0 %v3697_v17  ;;  %2000 = vmatprep.subr.bf16.mxu1 %v3700_v18  ;;  %v3782_v17 = vld [vmem:[%s4513_s28 + $0x5c8] ss:$16 sps:$4 sm:$0xff]   ;;  %v3787_v18 = vld [vmem:[%s4513_s28 + $0x5e4] ss:$16 sps:$4 sm:$0xff]  }
 0x173   : > { %1869 = vmatmul.mubr.bf16.vlgmr.msra.gmra.mrb[0].mxu0 %v617_v21  ;;  %1992 = vmatmul.mubr.bf16.vlgmr.msra.gmra.mrb[0].mxu1 %v617_v21  ;;  %v3788_v21 = vld [vmem:[%s4513_s28 + $0x5e8] ss:$16 sps:$4 sm:$0xff]  }
 0x174   : > { %1878 = vmatpush1.bf16.msra.mxu0 %v3695_v19  ;;  %2001 = vmatpush1.bf16.msra.mxu1 %v3698_v20  ;;  %v3790_v19 = vld [vmem:[%s4513_s28 + $0x5ec] ss:$16 sps:$4 sm:$0xff]   ;;  %v3785_v20 = vld [vmem:[%s4513_s28 + $0x5e0] ss:$16 sps:$4 sm:$0xff]  }
 0x175   : > { %1879 = vmatprep.subr.bf16.mxu0 %v3703_v22  ;;  %2002 = vmatprep.subr.bf16.mxu1 %v3706_v24  ;;  %v3793_v22 = vld [vmem:[%s4523_s30 + $0x4] ss:$8 sps:$4 sm:$0xff]   ;;  %v619_v24 = vpack.c.bf16 %v4681_v23, %v4681_v23  ;;  %v3802_v23 = vld [vmem:[%s4523_s30 + $0x34] ss:$8 sps:$4 sm:$0xff]  }
 0x176   : > { %1909 = vmatprep.mubr.bf16.mxu0 %v620_v9  ;;  %2032 = vmatprep.mubr.bf16.mxu1 %v620_v9  ;;  %v3794_v9 = vld [vmem:[%s4523_s30 + $0x10] ss:$8 sps:$4 sm:$0xff]  }
 0x178   : > { %1880 = vmatpush1.bf16.msra.mxu0 %v3701_v26  ;;  %2003 = vmatpush1.bf16.msra.mxu1 %v3704_v27  ;;  %v3796_v26 = vld [vmem:[%s4523_s30 + $0x14] ss:$8 sps:$4 sm:$0xff]   ;;  %v3799_v27 = vld [vmem:[%s4523_s30 + $0x24] ss:$8 sps:$4 sm:$0xff]  }
 0x179   : > { %1881 = vmatprep.subr.bf16.mxu0 %v3709_v28  ;;  %2004 = vmatprep.subr.bf16.mxu1 %v3712_v29  ;;  %v3797_v28 = vld [vmem:[%s4523_s30 + $0x20] ss:$8 sps:$4 sm:$0xff]   ;;  %v3800_v29 = vld [vmem:[%s4523_s30 + $0x30] ss:$8 sps:$4 sm:$0xff]  }
 0x17c   : > { %1882 = vmatpush1.bf16.msra.mxu0 %v3707_v30  ;;  %2005 = vmatpush1.bf16.msra.mxu1 %v3710_v31  ;;  %v3805_v30 = vld [vmem:[%s4523_s30 + $0x44] ss:$8 sps:$4 sm:$0xff]   ;;  %v3803_v31 = vld [vmem:[%s4523_s30 + $0x40] ss:$8 sps:$4 sm:$0xff]  }
 0x17d   : > { %1883 = vmatprep.subr.bf16.mxu0 %v3715_v32  ;;  %2006 = vmatprep.subr.bf16.mxu1 %v3718_v33  ;;  %v3808_v32 = vld [vmem:[%s4523_s30 + $0x54] ss:$8 sps:$4 sm:$0xff]   ;;  %v3806_v33 = vld [vmem:[%s4523_s30 + $0x50] ss:$8 sps:$4 sm:$0xff]  }
 0x180   : > { %1884 = vmatpush1.bf16.msra.mxu0 %v3713_v34  ;;  %2007 = vmatpush1.bf16.msra.mxu1 %v3716_v35  ;;  %v3811_v34 = vld [vmem:[%s4523_s30 + $0x64] ss:$8 sps:$4 sm:$0xff]   ;;  %v3809_v35 = vld [vmem:[%s4523_s30 + $0x60] ss:$8 sps:$4 sm:$0xff]  }
 0x181   : > { %1885 = vmatprep.subr.bf16.mxu0 %v3721_v36  ;;  %2008 = vmatprep.subr.bf16.mxu1 %v3724_v37  ;;  %v3814_v36 = vld [vmem:[%s4523_s30 + $0x74] ss:$8 sps:$4 sm:$0xff]   ;;  %v3812_v37 = vld [vmem:[%s4523_s30 + $0x70] ss:$8 sps:$4 sm:$0xff]  }
 0x184   : > { %1886 = vmatpush1.bf16.msra.mxu0 %v3719_v38  ;;  %2009 = vmatpush1.bf16.msra.mxu1 %v3722_v39  ;;  %v3817_v38 = vld [vmem:[%s4523_s30 + $0x84] ss:$8 sps:$4 sm:$0xff]   ;;  %v3815_v39 = vld [vmem:[%s4523_s30 + $0x80] ss:$8 sps:$4 sm:$0xff]  }
 0x185   : > { %1887 = vmatprep.subr.bf16.mxu0 %v3727_v40  ;;  %2010 = vmatprep.subr.bf16.mxu1 %v3730_v41  ;;  %v3820_v40 = vld [vmem:[%s4523_s30 + $0x94] ss:$8 sps:$4 sm:$0xff]   ;;  %v3818_v41 = vld [vmem:[%s4523_s30 + $0x90] ss:$8 sps:$4 sm:$0xff]  }
 0x188   : > { %1888 = vmatpush1.bf16.msra.mxu0 %v3725_v42  ;;  %2011 = vmatpush1.bf16.msra.mxu1 %v3728_v44  ;;  %v3823_v42 = vld [vmem:[%s4523_s30 + $0xa4] ss:$8 sps:$4 sm:$0xff]   ;;  %v3821_v44 = vld [vmem:[%s4523_s30 + $0xa0] ss:$8 sps:$4 sm:$0xff]  }
 0x189   : > { %1889 = vmatprep.subr.bf16.mxu0 %v3733_v45  ;;  %2012 = vmatprep.subr.bf16.mxu1 %v3736_v46  ;;  %v3826_v45 = vld [vmem:[%s4523_s30 + $0xb4] ss:$8 sps:$4 sm:$0xff]   ;;  %v3824_v46 = vld [vmem:[%s4523_s30 + $0xb0] ss:$8 sps:$4 sm:$0xff]  }
 0x18c   : > { %1890 = vmatpush1.bf16.msra.mxu0 %v3731_v47  ;;  %2013 = vmatpush1.bf16.msra.mxu1 %v3734_v48  ;;  %v3829_v47 = vld [vmem:[%s4523_s30 + $0xc4] ss:$8 sps:$4 sm:$0xff]   ;;  %v3827_v48 = vld [vmem:[%s4523_s30 + $0xc0] ss:$8 sps:$4 sm:$0xff]  }
 0x18d   : > { %1891 = vmatprep.subr.bf16.mxu0 %v3739_v49  ;;  %2014 = vmatprep.subr.bf16.mxu1 %v3742_v50  ;;  %v3832_v49 = vld [vmem:[%s4523_s30 + $0xd4] ss:$8 sps:$4 sm:$0xff]   ;;  %v3830_v50 = vld [vmem:[%s4523_s30 + $0xd0] ss:$8 sps:$4 sm:$0xff]  }
 0x190   : > { %1892 = vmatpush1.bf16.msra.mxu0 %v3737_v51  ;;  %2015 = vmatpush1.bf16.msra.mxu1 %v3740_v52  ;;  %v3835_v51 = vld [vmem:[%s4523_s30 + $0xe4] ss:$8 sps:$4 sm:$0xff]   ;;  %v3833_v52 = vld [vmem:[%s4523_s30 + $0xe0] ss:$8 sps:$4 sm:$0xff]  }
 0x191   : > { %1893 = vmatprep.subr.bf16.mxu0 %v3745_v53  ;;  %2016 = vmatprep.subr.bf16.mxu1 %v3748_v54  ;;  %v3838_v53 = vld [vmem:[%s4523_s30 + $0xf4] ss:$8 sps:$4 sm:$0xff]   ;;  %v3836_v54 = vld [vmem:[%s4523_s30 + $0xf0] ss:$8 sps:$4 sm:$0xff]  }
 0x194   : > { %1894 = vmatpush1.bf16.msra.mxu0 %v3743_v55  ;;  %2017 = vmatpush1.bf16.msra.mxu1 %v3746_v56  ;;  %v3841_v55 = vld [vmem:[%s4523_s30 + $0x104] ss:$8 sps:$4 sm:$0xff]  }
 0x195   : > { %1895 = vmatprep.subr.bf16.mxu0 %v3751_v57  ;;  %2018 = vmatprep.subr.bf16.mxu1 %v3754_v58  ;;  %v3887_v56 = vld [vmem:[%s4533_s22 + $0x40] sm:$0xff]   ;;  %v3889_v58 = vld [vmem:[%s4533_s22 + $0x48] sm:$0xff]  }
 0x196   : > { %v3888_v57 = vld [vmem:[%s4533_s22] sm:$0xff]  }
 0x198   : > { %1896 = vmatpush1.bf16.msra.mxu0 %v3749_v59  ;;  %2019 = vmatpush1.bf16.msra.mxu1 %v3752_v60  ;;  %v3890_v59 = vld [vmem:[%s4533_s22 + $0x8] sm:$0xff]   ;;  %v3891_v60 = vld [vmem:[%s4533_s22 + $0x50] sm:$0xff]  }
 0x199   : > { %1897 = vmatprep.subr.bf16.mxu0 %v3757_v61  ;;  %2020 = vmatprep.subr.bf16.mxu1 %v3760_v62  ;;  %v3892_v61 = vld [vmem:[%s4533_s22 + $0x10] sm:$0xff]   ;;  %v3893_v62 = vld [vmem:[%s4533_s22 + $0x58] sm:$0xff]  }
 0x19c   : > { %1898 = vmatpush1.bf16.msra.mxu0 %v3755_v63  ;;  %2021 = vmatpush1.bf16.msra.mxu1 %v3758_v0  ;;  %v3894_v63 = vld [vmem:[%s4533_s22 + $0x18] sm:$0xff]   ;;  %v3895_v0 = vld [vmem:[%s4533_s22 + $0x60] sm:$0xff]  }
 0x19d   : > { %1899 = vmatprep.subr.bf16.mxu0 %v3763_v1  ;;  %2022 = vmatprep.subr.bf16.mxu1 %v3766_v2  ;;  %v3896_v1 = vld [vmem:[%s4533_s22 + $0x20] sm:$0xff]   ;;  %v3897_v2 = vld [vmem:[%s4533_s22 + $0x68] sm:$0xff]  }
 0x1a0   : > { %1900 = vmatpush1.bf16.msra.mxu0 %v3761_v3  ;;  %2023 = vmatpush1.bf16.msra.mxu1 %v3764_v4  ;;  %v3898_v3 = vld [vmem:[%s4533_s22 + $0x28] sm:$0xff]   ;;  %v817_v4 = vsub.s32 0, %v4578_v43 }
 0x1a1   : > { %1901 = vmatprep.subr.bf16.mxu0 %v3769_v5  ;;  %2024 = vmatprep.subr.bf16.mxu1 %v3772_v6  ;;  %v4793_v5 = vld [vmem:[%s4521_s23] sm:$0xf]  ;;  %v821_v6 = vsub.s32 1, %v4578_v43 }
 0x1a4   : > { %1902 = vmatpush1.bf16.msra.mxu0 %v3767_v7  ;;  %2025 = vmatpush1.bf16.msra.mxu1 %v3770_v8  ;;  %v829_v7 = vsub.s32 3, %v4578_v43  ;;  %v818_v8 = vrot.slane %v4793_v5, %v817_v4 }
 0x1a5   : > { %1903 = vmatprep.subr.bf16.mxu0 %v3775_v10  ;;  %2026 = vmatprep.subr.bf16.mxu1 %v3778_v11  ;;  %v822_v10 = vrot.slane %v4793_v5, %v821_v6 }
 0x1a6   : > { %v830_v11 = vrot.slane %v4793_v5, %v829_v7  ;;  %v4181_v7 = vmov 0.0  }
 0x1a8   : > { %1904 = vmatpush1.bf16.msra.mxu0 %v3773_v12  ;;  %2027 = vmatpush1.bf16.msra.mxu1 %v3776_v13 }
 0x1a9   : > { %1905 = vmatprep.subr.bf16.mxu0 %v3781_v14  ;;  %2028 = vmatprep.subr.bf16.mxu1 %v3784_v15 }
 0x1ac   : > { %1906 = vmatpush1.bf16.msra.mxu0 %v3779_v16  ;;  %2029 = vmatpush1.bf16.msra.mxu1 %v3782_v17 }
 0x1ad   : > { %1907 = vmatprep.subr.bf16.mxu0 %v3787_v18  ;;  %2030 = vmatprep.subr.bf16.mxu1 %v3790_v19 }
 0x1b0   : > { %1908 = vmatpush1.bf16.msra.mxu0 %v3785_v20  ;;  %2031 = vmatpush1.bf16.msra.mxu1 %v3788_v21 }
 0x1b1   : > { %2445 = vmatprep.subr.bf16.mxu0 %v3793_v22  ;;  %3338 = vmatprep.subr.bf16.mxu1 %v3887_v56  ;;  %v3878_v56 = vld [vmem:[%s4523_s30 + $0x1d0] ss:$8 sps:$4 sm:$0xff]  }
 0x1b3   : > { %1910 = vmatmul.mubr.bf16.vlgmr.msra.gmra.mrb[0].mxu0 %v619_v24  ;;  %2033 = vmatmul.mubr.bf16.vlgmr.msra.gmra.mrb[0].mxu1 %v619_v24 }
 0x1b4   : > { %2446 = vmatpush1.bf16.msra.mxu0 %v3791_v25  ;;  %3339 = vmatpush3.bf16.msra.mxu1 %v3888_v57 }
 0x1b5   : > { %2447 = vmatprep.subr.bf16.mxu0 %v3796_v26  ;;  %3340 = vmatprep.subr.bf16.mxu1 %v3889_v58  ;;  %v3883_v58 = vld [vmem:[%s4523_s30 + $0x1e4] ss:$8 sps:$4 sm:$0xff]  }
 0x1b8   : > { %2448 = vmatpush1.bf16.msra.mxu0 %v3794_v9  ;;  %3341 = vmatpush3.bf16.msra.mxu1 %v3890_v59  ;;  %v3881_v59 = vld [vmem:[%s4523_s30 + $0x1e0] ss:$8 sps:$4 sm:$0xff]  }
 0x1b9   : > { %2449 = vmatprep.subr.bf16.mxu0 %v3799_v27  ;;  %3342 = vmatprep.subr.bf16.mxu1 %v3891_v60  ;;  %v3839_v27 = vld [vmem:[%s4523_s30 + $0x100] ss:$8 sps:$4 sm:$0xff]  }
 0x1bc   : > { %2450 = vmatpush1.bf16.msra.mxu0 %v3797_v28  ;;  %3343 = vmatpush3.bf16.msra.mxu1 %v3892_v61  ;;  %v3886_v61 = vld [vmem:[%s4523_s30 + $0x1f4] ss:$8 sps:$4 sm:$0xff]  }
 0x1bd   : > { %2451 = vmatprep.subr.bf16.mxu0 %v3802_v23  ;;  %3344 = vmatprep.subr.bf16.mxu1 %v3893_v62  ;;  %v3844_v23 = vld [vmem:[%s4523_s30 + $0x114] ss:$8 sps:$4 sm:$0xff]   ;;  %v3884_v62 = vld [vmem:[%s4523_s30 + $0x1f0] ss:$8 sps:$4 sm:$0xff]  }
 0x1c0   : > { %2452 = vmatpush1.bf16.msra.mxu0 %v3800_v29  ;;  %3345 = vmatpush3.bf16.msra.mxu1 %v3894_v63 }
 0x1c1   : > { %2453 = vmatprep.subr.bf16.mxu0 %v3805_v30  ;;  %3346 = vmatprep.subr.bf16.mxu1 %v3895_v0  ;;  %v3842_v30 = vld [vmem:[%s4523_s30 + $0x110] ss:$8 sps:$4 sm:$0xff]  }
 0x1c4   : > { %2454 = vmatpush1.bf16.msra.mxu0 %v3803_v31  ;;  %3347 = vmatpush3.bf16.msra.mxu1 %v3896_v1  ;;  %v3847_v31 = vld [vmem:[%s4523_s30 + $0x124] ss:$8 sps:$4 sm:$0xff]   ;;  %v3899_v1 = vld [vmem:[%s4533_s22 + $0x70] sm:$0xff]  }
 0x1c5   : > { %2455 = vmatprep.subr.bf16.mxu0 %v3808_v32  ;;  %3348 = vmatprep.subr.bf16.mxu1 %v3897_v2  ;;  %v3845_v32 = vld [vmem:[%s4523_s30 + $0x120] ss:$8 sps:$4 sm:$0xff]   ;;  %v3900_v2 = vld [vmem:[%s4533_s22 + $0x30] sm:$0xff]  }
 0x1c8   : > { %2456 = vmatpush1.bf16.msra.mxu0 %v3806_v33  ;;  %3349 = vmatpush3.bf16.msra.mxu1 %v3898_v3  ;;  %v3850_v33 = vld [vmem:[%s4523_s30 + $0x134] ss:$8 sps:$4 sm:$0xff]  }
 0x1c9   : > { %2457 = vmatprep.subr.bf16.mxu0 %v3811_v34  ;;  %v3848_v34 = vld [vmem:[%s4523_s30 + $0x130] ss:$8 sps:$4 sm:$0xff]   ;;  %3350 = vmatprep.subr.bf16.mxu1 %v3899_v1  ;;  %v3901_v3 = vld [vmem:[%s4533_s22 + $0x78] sm:$0xff]  }
 0x1cc   : > { %2458 = vmatpush1.bf16.msra.mxu0 %v3809_v35  ;;  %v3853_v35 = vld [vmem:[%s4523_s30 + $0x144] ss:$8 sps:$4 sm:$0xff]   ;;  %3351 = vmatpush3.bf16.msra.mxu1 %v3900_v2 }
 0x1cd   : > { %2459 = vmatprep.subr.bf16.mxu0 %v3814_v36  ;;  %v3851_v36 = vld [vmem:[%s4523_s30 + $0x140] ss:$8 sps:$4 sm:$0xff]   ;;  %3352 = vmatprep.subr.bf16.mxu1 %v3901_v3 }
 0x1d0   : > { %2460 = vmatpush1.bf16.msra.mxu0 %v3812_v37  ;;  %v3856_v37 = vld [vmem:[%s4523_s30 + $0x154] ss:$8 sps:$4 sm:$0xff]  }
 0x1d1   : > { %2461 = vmatprep.subr.bf16.mxu0 %v3817_v38  ;;  %v3854_v38 = vld [vmem:[%s4523_s30 + $0x150] ss:$8 sps:$4 sm:$0xff]  }
 0x1d4   : > { %2462 = vmatpush1.bf16.msra.mxu0 %v3815_v39  ;;  %v3859_v39 = vld [vmem:[%s4523_s30 + $0x164] ss:$8 sps:$4 sm:$0xff]  }
 0x1d5   : > { %2463 = vmatprep.subr.bf16.mxu0 %v3820_v40  ;;  %v3857_v40 = vld [vmem:[%s4523_s30 + $0x160] ss:$8 sps:$4 sm:$0xff]  }
 0x1d8   : > { %2464 = vmatpush1.bf16.msra.mxu0 %v3818_v41  ;;  %v3862_v41 = vld [vmem:[%s4523_s30 + $0x174] ss:$8 sps:$4 sm:$0xff]  }
 0x1d9   : > { %2465 = vmatprep.subr.bf16.mxu0 %v3823_v42  ;;  %v3860_v42 = vld [vmem:[%s4523_s30 + $0x170] ss:$8 sps:$4 sm:$0xff]  }
 0x1dc   : > { %2466 = vmatpush1.bf16.msra.mxu0 %v3821_v44  ;;  %v3865_v44 = vld [vmem:[%s4523_s30 + $0x184] ss:$8 sps:$4 sm:$0xff]  }
 0x1dd   : > { %2467 = vmatprep.subr.bf16.mxu0 %v3826_v45  ;;  %v3863_v45 = vld [vmem:[%s4523_s30 + $0x180] ss:$8 sps:$4 sm:$0xff]  }
 0x1e0   : > { %2468 = vmatpush1.bf16.msra.mxu0 %v3824_v46  ;;  %v3868_v46 = vld [vmem:[%s4523_s30 + $0x194] ss:$8 sps:$4 sm:$0xff]  }
 0x1e1   : > { %2469 = vmatprep.subr.bf16.mxu0 %v3829_v47  ;;  %v3866_v47 = vld [vmem:[%s4523_s30 + $0x190] ss:$8 sps:$4 sm:$0xff]  }
 0x1e4   : > { %2470 = vmatpush1.bf16.msra.mxu0 %v3827_v48  ;;  %v3871_v48 = vld [vmem:[%s4523_s30 + $0x1a4] ss:$8 sps:$4 sm:$0xff]  }
 0x1e5   : > { %2471 = vmatprep.subr.bf16.mxu0 %v3832_v49  ;;  %v3869_v49 = vld [vmem:[%s4523_s30 + $0x1a0] ss:$8 sps:$4 sm:$0xff]  }
 0x1e8   : > { %2472 = vmatpush1.bf16.msra.mxu0 %v3830_v50  ;;  %v3874_v50 = vld [vmem:[%s4523_s30 + $0x1b4] ss:$8 sps:$4 sm:$0xff]  }
 0x1e9   : > { %2473 = vmatprep.subr.bf16.mxu0 %v3835_v51  ;;  %v3872_v51 = vld [vmem:[%s4523_s30 + $0x1b0] ss:$8 sps:$4 sm:$0xff]  }
 0x1ec   : > { %2474 = vmatpush1.bf16.msra.mxu0 %v3833_v52  ;;  %v3877_v52 = vld [vmem:[%s4523_s30 + $0x1c4] ss:$8 sps:$4 sm:$0xff]  }
 0x1ed   : > { %2475 = vmatprep.subr.bf16.mxu0 %v3838_v53  ;;  %v3875_v53 = vld [vmem:[%s4523_s30 + $0x1c0] ss:$8 sps:$4 sm:$0xff]  }
 0x1f0   : > { %2476 = vmatpush1.bf16.msra.mxu0 %v3836_v54  ;;  %v825_v54 = vsub.s32 2, %v4578_v43  ;;  %v3904_v43 = vld [vmem:[%s4852_s19 + $0x8] sm:$0xff]  }
 0x1f1   : > { %2486 = vmatprep.subr.bf16.mxu0 %v3841_v55  ;;  %v3880_v55 = vld [vmem:[%s4523_s30 + $0x1d4] ss:$8 sps:$4 sm:$0xff]  }
 0x1f2   : > { %v826_v57 = vrot.slane %v4793_v5, %v825_v54  ;;  %v3902_v5 = vld [vmem:[%s4533_s22 + $0x38] sm:$0xff]  }
 0x1f3   : > { %3353 = vmatpush3.bf16.msra.mxu1 %v3902_v5 }
 0x1f4   : > { %3369 = vmatprep.subr.bf16.mxu1 %v4181_v7 }
 0x286   : > { %v1911_v12 = vpop.f32.mrb[0].mxu0  ;;  %v4804_v13 = vpop.f32.mrb[0].mxu1 }
 0x287   : > { %v3389_v14 = vadd.f32 %v1911_v12, %v818_v8  ;;  %v1913_v15 = vpop.f32.mrb[1].mxu0  ;;  %v2036_v16 = vpop.f32.mrb[1].mxu1  ;;  %v3391_v60 = vadd.f32 %v4804_v13, %v826_v57  ;;  %v2113_v8 = vld [vmem:[%s4531_s27] sm:$0x3] }
 0x288   : > { %v3390_v17 = vadd.f32 %v1913_v15, %v822_v10  ;;  %v3392_v18 = vadd.f32 %v2036_v16, %v830_v11  ;;  %v1915_v19 = vpop.f32.mrb[2].mxu0  ;;  %v2038_v20 = vpop.f32.mrb[2].mxu1  ;;  %v2118_v10 = vrot.slane %v2113_v8, %v817_v4  ;;  %v2122_v11 = vrot.slane %v2113_v8, %v821_v6  ;;  %v3905_v4 = vld [vmem:[%s4852_s19 + $0x10] sm:$0xff]   ;;  %v3906_v6 = vld [vmem:[%s4852_s19 + $0x18] sm:$0xff]  }
 0x289   : > { %v2041_v21 = vmax.f32 %v3389_v14, 0.0  ;;  %v1916_v22 = vpop.f32.mrb[3].mxu0  ;;  %v2039_v24 = vpop.f32.mrb[3].mxu1  ;;  %v2043_v63 = vmax.f32 %v3391_v60, 0.0 }
 0x28a   : > { %v2042_v25 = vmax.f32 %v3390_v17, 0.0  ;;  %v2044_v26 = vmax.f32 %v3392_v18, 0.0  ;;  %v3907_v24 = vld [vmem:[%s4852_s19 + $0x20] sm:$0xff]  }
 0x28b   : > { %v2045_v28 = vpack.c.bf16 %v2041_v21, %v2041_v21  ;;  %v2047_v0 = vpack.c.bf16 %v2043_v63, %v2043_v63  ;;  %v3903_v21 = vld [vmem:[%s4852_s19] sm:$0xff]  }
 0x28c   : > { %v2046_v9 = vpack.c.bf16 %v2042_v25, %v2042_v25  ;;  %v2048_v29 = vpack.c.bf16 %v2044_v26, %v2044_v26  ;;  %v3908_v25 = vld [vmem:[%s4852_s19 + $0x28] sm:$0xff]   ;;  %v3909_v26 = vld [vmem:[%s4852_s19 + $0x30] sm:$0xff]  }
 0x28e   : > { %2477 = vmatprep.mubr.bf16.mxu0 %v2046_v9  ;;  %v3910_v9 = vld [vmem:[%s4852_s19 + $0x38] sm:$0xff]  }
 0x28f   : > { %2478 = vmatmul.mubr.bf16.vlgmr.msra.gmra.mrb[4].mxu0 %v2045_v28  ;;  %v3305_v28 = vld [vmem:[%s501_s15] ss:$0 sm:$0xff] }
 0x290   : > { %2487 = vmatpush1.bf16.msra.mxu0 %v3839_v27  ;;  %2518 = vmatprep.mubr.bf16.mxu0 %v2048_v29 }
 0x291   : > { %2488 = vmatprep.subr.bf16.mxu0 %v3844_v23 }
 0x294   : > { %2489 = vmatpush1.bf16.msra.mxu0 %v3842_v30 }
 0x295   : > { %2490 = vmatprep.subr.bf16.mxu0 %v3847_v31 }
 0x298   : > { %2491 = vmatpush1.bf16.msra.mxu0 %v3845_v32 }
 0x299   : > { %2492 = vmatprep.subr.bf16.mxu0 %v3850_v33 }
 0x29c   : > { %2493 = vmatpush1.bf16.msra.mxu0 %v3848_v34 }
 0x29d   : > { %2494 = vmatprep.subr.bf16.mxu0 %v3853_v35  ;;  %v3322_v35 = vld [vmem:[%s574_s29] ss:$0 sm:$0xff] }
 0x2a0   : > { %2495 = vmatpush1.bf16.msra.mxu0 %v3851_v36 }
 0x2a1   : > { %2496 = vmatprep.subr.bf16.mxu0 %v3856_v37 }
 0x2a4   : > { %2497 = vmatpush1.bf16.msra.mxu0 %v3854_v38 }
 0x2a5   : > { %2498 = vmatprep.subr.bf16.mxu0 %v3859_v39 }
 0x2a8   : > { %2499 = vmatpush1.bf16.msra.mxu0 %v3857_v40 }
 0x2a9   : > { %2500 = vmatprep.subr.bf16.mxu0 %v3862_v41 }
 0x2ac   : > { %2501 = vmatpush1.bf16.msra.mxu0 %v3860_v42 }
 0x2ad   : > { %2502 = vmatprep.subr.bf16.mxu0 %v3865_v44 }
 0x2b0   : > { %2503 = vmatpush1.bf16.msra.mxu0 %v3863_v45 }
 0x2b1   : > { %2504 = vmatprep.subr.bf16.mxu0 %v3868_v46 }
 0x2b4   : > { %2505 = vmatpush1.bf16.msra.mxu0 %v3866_v47 }
 0x2b5   : > { %2506 = vmatprep.subr.bf16.mxu0 %v3871_v48 }
 0x2b8   : > { %2507 = vmatpush1.bf16.msra.mxu0 %v3869_v49 }
 0x2b9   : > { %2508 = vmatprep.subr.bf16.mxu0 %v3874_v50 }
 0x2bc   : > { %2509 = vmatpush1.bf16.msra.mxu0 %v3872_v51 }
 0x2bd   : > { %2510 = vmatprep.subr.bf16.mxu0 %v3877_v52 }
 0x2c0   : > { %2511 = vmatpush1.bf16.msra.mxu0 %v3875_v53 }
 0x2c1   : > { %2512 = vmatprep.subr.bf16.mxu0 %v3880_v55 }
 0x2c4   : > { %2513 = vmatpush1.bf16.msra.mxu0 %v3878_v56 }
 0x2c5   : > { %2514 = vmatprep.subr.bf16.mxu0 %v3883_v58 }
 0x2c8   : > { %2515 = vmatpush1.bf16.msra.mxu0 %v3881_v59 }
 0x2c9   : > { %2516 = vmatprep.subr.bf16.mxu0 %v3886_v61 }
 0x2cc   : > { %2517 = vmatpush1.bf16.msra.mxu0 %v3884_v62 }
 0x2cf   : > { %2519 = vmatmul.mubr.bf16.vlgmr.msra.gmra.mrb[4].mxu0 %v2047_v0 }
 0x3a2   : > { %v2520_v12 = vpop.f32.mrb[4].mxu0 }
 0x3a3   : > { %v3393_v13 = vadd.f32 %v2520_v12, %v2118_v10  ;;  %v2522_v14 = vpop.f32.mrb[5].mxu0 }
 0x3a4   : > { %v3394_v15 = vadd.f32 %v2522_v14, %v2122_v11  ;;  %v2524_v16 = vpop.f32.mrb[6].mxu0 }
 0x3a5   : > { %v2527_v17 = vmax.f32 %v3393_v13, 0.0  ;;  %v2525_v18 = vpop.f32.mrb[7].mxu0 }
 0x3a6   : > { %v2528_v19 = vmax.f32 %v3394_v15, 0.0 }
 0x3a7   : > { %v2529_v22 = vpack.c.bf16 %v2527_v17, %v2527_v17 }
 0x3a8   : > { %v2530_v20 = vpack.c.bf16 %v2528_v19, %v2528_v19 }
 0x3aa   : > { %2698 = vmatprep.mubr.bf16.mxu1 %v2530_v20 }
 0x3ab   : > { %2699 = vmatmul.mubr.bf16.vlgmr.msra.gmra.mrb[4].mxu1 %v2529_v22 }
 0x3ac   : > { %3370 = vmatpush3.bf16.msra.mxu1 %v3903_v21  ;;  %3385 = vmatprep.mubr.msk.bf16.mxu1 %vm4182_vm0, %v4181_v7 }
 0x3ad   : > { %3371 = vmatprep.subr.bf16.mxu1 %v4181_v7 }
 0x3b0   : > { %3372 = vmatpush3.bf16.msra.mxu1 %v3904_v43 }
 0x3b1   : > { %3373 = vmatprep.subr.bf16.mxu1 %v4181_v7 }
 0x3b4   : > { %3374 = vmatpush3.bf16.msra.mxu1 %v3905_v4 }
 0x3b5   : > { %3375 = vmatprep.subr.bf16.mxu1 %v4181_v7 }
 0x3b8   : > { %3376 = vmatpush3.bf16.msra.mxu1 %v3906_v6 }
 0x3b9   : > { %3377 = vmatprep.subr.bf16.mxu1 %v4181_v7 }
 0x3bc   : > { %3378 = vmatpush3.bf16.msra.mxu1 %v3907_v24 }
 0x3bd   : > { %3379 = vmatprep.subr.bf16.mxu1 %v4181_v7 }
 0x3c0   : > { %3380 = vmatpush3.bf16.msra.mxu1 %v3908_v25 }
 0x3c1   : > { %3381 = vmatprep.subr.bf16.mxu1 %v4181_v7 }
 0x3c4   : > { %3382 = vmatpush3.bf16.msra.mxu1 %v3909_v26 }
 0x3c5   : > { %3383 = vmatprep.subr.bf16.mxu1 %v4181_v7 }
 0x3c8   : > { %3384 = vmatpush3.bf16.msra.mxu1 %v3910_v9 }
 0x47e   : > { %v3354_v27 = vpop.f32.mrb[4].mxu1 }
 0x47f   : > { %v3355_v23 = vpop.f32.mrb[5].mxu1 }
 0x480   : > { %v3356_v29 = vadd.f32 %v3355_v23, %v3354_v27  ;;  %v3357_v30 = vpop.f32.mrb[6].mxu1 }
 0x481   : > { %v3358_v31 = vpop.f32.mrb[7].mxu1 }
 0x482   : > { %v2701_v32 = vadd.f32 %v3356_v29, %v3305_v28 }
 0x484   : > { %v2706_v33 = vmax.f32 %v2701_v32, 0.0 }
 0x486   : > { %v2707_v34 = vpack.c.bf16 %v2706_v33, %v2706_v33 }
 0x488   : > { %3386 = vmatmul.mubr.bf16.vlgmr.msra.gmra.mrb[8].mxu1 %v2707_v34 }
 0x55b   : > { %v2813_v36 = vpop.f32.mrb[8].mxu1 }
 0x55c   : > { %v2814_v37 = vadd.f32 %v3322_v35, %v2813_v36  ;;  %v3387_v38 = vpop.f32.mrb[9].mxu1 }
 0x55d   : > { %v2816_v39 = vpop.f32.mrb[10].mxu1 }
 0x55e   : > { %2819 = vst [vmem:[%s578_s24] sm:$0x3] %v2814_v37  ;;  %v3388_v40 = vpop.f32.mrb[11].mxu1 }
 0x55f PF: > { %s4936_s5 = sld [smem:[#allocation17_spill]]  ;;  %s4937_s11 = sld [smem:[#allocation18_spill]] }
 0x560   : > { %p26_p4 = scmp.ge.s32.totalorder %s4254_s13, 5   ;;  %s4938_s30 = smov %s4157_s10 }
 0x561   : > { %s4940_s12 = smov %s4254_s13 }
 0x562   :  { %28 = sbr.rel (!%p26_p4) target bundleno = 13 (0xd), region = 166 }
 0x565   : > { %s4939_s10 = smov %s4936_s5 }
 0x569   :  { %2839 = vsyncpa [#allocation3], 1 }
 0x56a   :  { %2841 = vsyncpa [#allocation3 + $0x1], 1 }
 0x56b   :  { %2842 = vsyncpa [#allocation5], 1 }
 0x56c   :  { %2844 = vsyncpa [#allocation5 + $0x1], 1 }
 0x56d   :  { %2845 = vsyncpa [#allocation8], 1 }
 0x56e   :  { %2847 = vsyncpa [#allocation8 + $0x1], 1 }
 0x56f   :  { %2848 = vsyncpa [#allocation11], 1 }
 0x570   :  { %2850 = vsyncpa [#allocation11 + $0x1], 1 }

</bundles_post_ra>
